<compile_context>
chip_gen: v6e
topology: v6e:2x2x1
jax: 0.10.0
libtpu: 0.0.40
codegen_flags: <defaults>
</compile_context>

<pallas_src>
import functools

import numpy as np
import jax
import jax.numpy as jnp
from jax import lax
from jax.experimental import pallas as pl
from jax.experimental.pallas import tpu as pltpu

_LANE = 128


# --------------------------- shared in-kernel math ---------------------------

def _contra_weights_from_gram(g):
    """CONTRA finalize: Gram (n, n) f32 -> (w_gate, w_norm), both (1, n) f32.

    w_gate is CONTRA's return value (wv * C); w_norm = w_gate / sum(w_gate) is
    the aggregation weight used for the weighted sum.
    """
    n = g.shape[0]
    row = lax.broadcasted_iota(jnp.int32, (n, n), 0)
    col = lax.broadcasted_iota(jnp.int32, (n, n), 1)
    eye = (row == col).astype(jnp.float32)

    # cosine similarity: cs[i,j] = G[i,j]*rsqrt(G[i,i])*rsqrt(G[j,j]) - I
    diag_col = jnp.sum(g * eye, axis=1, keepdims=True)        # (n, 1) = G[i, i]
    diag_row = jnp.sum(g * eye, axis=0, keepdims=True)        # (1, n) = G[j, j]
    # eps guards zero-norm clients; the float64 reference would propagate NaN
    # there instead (deliberate, documented deviation).
    inv_c = lax.rsqrt(jnp.maximum(diag_col, 1e-30))
    inv_r = lax.rsqrt(jnp.maximum(diag_row, 1e-30))
    cs = g * inv_c * inv_r - eye                               # (n, n), symmetric

    # CONTRA's maxcs (argsort/[:-20]/average trick) == column mean of cs.
    m_row = jnp.mean(cs, axis=0, keepdims=True)                # (1, n): maxcs[col]
    m_col = jnp.mean(cs, axis=1, keepdims=True)                # (n, 1): maxcs[row]

    # r / ele / C gate.  r[i] in {0.9, 1.1} before normalization, so the
    # sort-based "ele = sorted(r)[-10]; C[i] = r[i] >= int(ele)" rule reduces
    # exactly to a threshold count (no in-kernel sort needed):
    #   num_good = #{i : maxcs[i] <= 0.05}
    #   C[i] = (maxcs[i] <= 0.05) if num_good >= 10 else 1
    good = (m_row <= 0.05).astype(jnp.float32)                 # (1, n)
    num_good = jnp.sum(good, axis=1, keepdims=True)            # (1, 1)
    c_gate = jnp.where(num_good < 10.0, jnp.ones_like(good), good)

    # cs[i][j] *= maxcs[i]/maxcs[j]  iff  maxcs[i] < maxcs[j].  Built directly
    # in "client i on lanes" orientation (cs is symmetric) so wv comes out as a
    # lane-dense (1, n) row; exact divide (not approx reciprocal) per review.
    scale = jnp.where(m_row < m_col, m_row / m_col, jnp.float32(1.0))
    wv = 1.0 - jnp.max(cs * scale, axis=0, keepdims=True)      # (1, n)

    wv = jnp.clip(wv, 0.0, 1.0)                                # wv[wv>1]=1; wv[wv<0]=0
    wv = wv / jnp.max(wv, axis=1, keepdims=True)               # NaN iff all-zero (matches ref)
    wv = jnp.where(wv == 1.0, jnp.float32(0.99), wv)
    wv = jnp.log(wv / (1.0 - wv)) + 0.5
    # numpy precedence quirk in the reference: wv[(np.isinf(wv) + wv) > 1] = 1
    wv = jnp.where((jnp.isinf(wv).astype(jnp.float32) + wv) > 1.0,
                   jnp.float32(1.0), wv)
    wv = jnp.where(wv < 0.0, jnp.float32(0.0), wv)

    w_gate = wv * c_gate                                       # (1, n)
    w_norm = w_gate / jnp.sum(w_gate, axis=1, keepdims=True)   # (1, n)
    return w_gate, w_norm


# --------------------------- Pallas kernels ----------------------------------

def _contra_fused_kernel(x_ref, out_ref, wgate_ref):
    """Single-block fused kernel: x read from HBM exactly once."""
    xf = x_ref[...].astype(jnp.float32)                        # (d, n) VMEM-resident
    # Gram: contract the d (sublane) axis of both operands -> transposed-LHS
    # vmatmul on the MXU (no separate XLU transpose of the block).
    g = lax.dot_general(xf, xf, (((0,), (0,)), ((), ())),
                        preferred_element_type=jnp.float32)    # (n, n)
    w_gate, w_norm = _contra_weights_from_gram(g)
    wgate_ref[...] = w_gate
    # out(1, d) = w(1, n) @ x(d, n)^T  -> lane-dense output row on the MXU.
    out_ref[...] = lax.dot_general(w_norm, xf, (((1,), (1,)), ((), ())),
                                   preferred_element_type=jnp.float32)


def _gram_gate_kernel(x_ref, wgate_ref, wnorm_ref, g_ref):
    """Tiled Gram accumulation + fused CONTRA finalize (streaming fallback)."""
    k = pl.program_id(0)

    @pl.when(k == 0)
    def _init():
        g_ref[...] = jnp.zeros_like(g_ref)

    x = x_ref[...]                                             # (tile_d, n) stream dtype
    # bf16 x bf16 -> f32 accumulate on the MXU (or f32 x f32 when streaming f32).
    g_ref[...] += lax.dot_general(x, x, (((0,), (0,)), ((), ())),
                                  preferred_element_type=jnp.float32)

    @pl.when(k == pl.num_programs(0) - 1)
    def _finalize():
        w_gate, w_norm = _contra_weights_from_gram(g_ref[...])
        wgate_ref[...] = w_gate
        wnorm_ref[...] = w_norm


def _wsum_kernel(w_ref, x_ref, out_ref):
    # out(1, tile_d) = w(1, n) @ x(tile_d, n)^T  -> lane-dense output block.
    out_ref[...] = lax.dot_general(
        w_ref[...], x_ref[...].astype(jnp.float32), (((1,), (1,)), ((), ())),
        preferred_element_type=jnp.float32)


# --------------------------- pallas_call wrappers -----------------------------

def _contra_fused(x_dn, vmem_limit):
    d, n = x_dn.shape
    return pl.pallas_call(
        _contra_fused_kernel,
        out_shape=(jax.ShapeDtypeStruct((1, d), jnp.float32),   # weighted sum (row)
                   jax.ShapeDtypeStruct((1, n), jnp.float32)),  # w_gate (CONTRA output)
        compiler_params=pltpu.CompilerParams(vmem_limit_bytes=vmem_limit),
    )(x_dn)


def _gram_gate(x_dn, tile_d, vmem_limit):
    d, n = x_dn.shape
    return pl.pallas_call(
        _gram_gate_kernel,
        out_shape=(jax.ShapeDtypeStruct((1, n), jnp.float32),   # w_gate
                   jax.ShapeDtypeStruct((1, n), jnp.float32)),  # w_norm
        grid_spec=pltpu.PrefetchScalarGridSpec(
            num_scalar_prefetch=0,
            grid=(d // tile_d,),
            in_specs=[pl.BlockSpec((tile_d, n), lambda k: (k, 0))],
            out_specs=(pl.BlockSpec((1, n), lambda k: (0, 0)),
                       pl.BlockSpec((1, n), lambda k: (0, 0))),
            scratch_shapes=[pltpu.VMEM((n, n), jnp.float32)]),
        compiler_params=pltpu.CompilerParams(
            dimension_semantics=("arbitrary",),                 # d axis is a reduction
            vmem_limit_bytes=vmem_limit),
    )(x_dn)


def _weighted_sum(x_dn, w_row, tile_d, vmem_limit):
    d, n = x_dn.shape
    return pl.pallas_call(
        _wsum_kernel,
        out_shape=jax.ShapeDtypeStruct((1, d), jnp.float32),
        grid_spec=pltpu.PrefetchScalarGridSpec(
            num_scalar_prefetch=0,
            grid=(d // tile_d,),
            in_specs=[pl.BlockSpec((1, n), lambda i: (0, 0)),
                      pl.BlockSpec((tile_d, n), lambda i: (i, 0))],
            out_specs=pl.BlockSpec((1, tile_d), lambda i: (0, i))),
        compiler_params=pltpu.CompilerParams(
            dimension_semantics=("parallel",),                  # independent d tiles
            vmem_limit_bytes=vmem_limit),
    )(w_row, x_dn)


# --------------------------- VMEM-aware sizing --------------------------------

@functools.lru_cache(maxsize=None)
def _vmem_budget_bytes():
    phys = 64 * 1024 * 1024                       # conservative default (v7x physical)
    try:
        phys = int(getattr(pltpu.get_tpu_info(), "vmem_capacity_bytes", phys))
    except Exception:
        pass
    # ~48 MiB on 64-MiB parts (v7x); capped at 96 MiB on 128-MiB parts (v5e/v6e).
    return min((phys * 3) // 4, 96 * 1024 * 1024)


def _lane_pad(n):
    return max(_LANE, ((n + _LANE - 1) // _LANE) * _LANE)


def _fused_footprint_bytes(d, n, itemsize):
    pn = _lane_pad(n)
    x_stream = d * pn * itemsize                  # resident x block (budget 2 buffers)
    x_f32 = d * pn * 4                            # in-kernel f32 copy for the MXU dots
    small = pn * pn * 4 + 8 * max(d, _LANE) * 4 + 16 * pn * 4
    return 2 * x_stream + x_f32 + small + (2 << 20)


def _pick_tile_d(d, n, itemsize, budget):
    """VMEM-aware tile size for the streaming fallback path.

    A (tile_d, n) tile occupies tile_d * max(n, 128) * itemsize bytes in VMEM
    (n < 128 pads to 128 lanes); it is double-buffered and cast to f32 once
    inside the wsum kernel, and must fit in roughly half the scoped budget.
    """
    pn = _lane_pad(n)
    per_row = pn * (2 * itemsize + 4)
    reserve = pn * pn * 4 + (4 << 20)
    cap_rows = (budget // 2 - reserve) // per_row
    cap = max((cap_rows // _LANE) * _LANE, _LANE)
    if d <= cap:
        return d                                   # single full-d block, grid of 1
    t = cap
    while t >= _LANE:
        if d % t == 0:
            return t
        t -= _LANE
    # TODO(synk): pad d up to a multiple of 128 (zero rows are harmless for both
    # the Gram and the weighted sum) instead of failing for awkward d.
    raise ValueError(f"no multiple-of-128 tile divides d={d}; pad d to a multiple of 128")


# --------------------------- forward (single jit per config) ------------------

@functools.partial(jax.jit, static_argnames=("fused", "tile_d", "vmem_limit"))
def _forward_jit(x_dn, fused, tile_d, vmem_limit):
    d, n = x_dn.shape
    if fused:
        out_row, w_gate = _contra_fused(x_dn, vmem_limit)
    else:
        w_gate, w_norm = _gram_gate(x_dn, tile_d, vmem_limit)
        out_row = _weighted_sum(x_dn, w_norm, tile_d, vmem_limit)
    return out_row.reshape(d, 1), w_gate.reshape(n)


def net_forward(inp, *, stream_dtype=jnp.bfloat16, force_tiled=False, tile_d=None):
    """inp: (1, d, n) -> (out (d, 1) float32, attackers list).

    `stream_dtype` controls HBM streaming precision only (bf16 halves traffic on
    the memory-bound path); Gram / finalize / weights are always float32.
    """
    x_dn = jnp.asarray(inp)[0]                    # (d, n) native layout; no transpose
    d, n = x_dn.shape
    assert n > 20, "CONTRA slices temp[:-20]; needs n_clients > 20"
    x_dn = x_dn.astype(stream_dtype)
    itemsize = jnp.dtype(stream_dtype).itemsize
    budget = int(_vmem_budget_bytes())

    # Fused (read-x-once) path when x comfortably fits; budget//2 leaves
    # headroom for compiler temporaries under v7x's tighter VMEM.
    fused = (not force_tiled) and _fused_footprint_bytes(d, n, itemsize) <= budget // 2
    if fused:
        tile_d = d                                # unused; keeps the jit cache key stable
    elif tile_d is None:
        tile_d = _pick_tile_d(d, n, itemsize, budget)
    if not fused:
        assert d % tile_d == 0, "tile_d must divide d"
        assert tile_d == d or tile_d % _LANE == 0, "tile_d must be a multiple of 128"

    out, w_gate = _forward_jit(x_dn, fused=fused, tile_d=int(tile_d), vmem_limit=budget)
    # TODO(synk): the data-dependent `attackers` Python list (and the module's
    # print side-effects) have no static-shape Pallas equivalent; extract the
    # list on host from the (n,)-sized gate vector.
    w_np = np.asarray(jax.device_get(w_gate))
    attackers = [i for i in range(n) if w_np[i] == 1.0]
    return out, attackers


# --------------------------- NumPy (float64) reference ------------------------

def _contra_ref(grads):
    grads = np.asarray(grads, np.float64)
    n_clients = grads.shape[0]
    r = np.ones(n_clients)
    gn = grads / np.linalg.norm(grads, axis=1, keepdims=True)
    cs = gn @ gn.T - np.eye(n_clients)
    temp = cs[np.argsort(cs, axis=1)]
    maxcs = np.average(temp[:-20], axis=1)[0]
    for i in range(n_clients):
        r[i] = r[i] - 0.1 if maxcs[i] > 0.05 else r[i] + 0.1
    r = r / np.max(r)
    ele = r[np.argsort(r)[-10]]
    C = [1 if i >= int(ele) else 0 for i in r]
    with np.errstate(divide="ignore", invalid="ignore"):
        for i in range(n_clients):
            for j in range(n_clients):
                if i == j:
                    continue
                if maxcs[i] < maxcs[j]:
                    cs[i][j] = cs[i][j] * maxcs[i] / maxcs[j]
    wv = 1 - np.max(cs, axis=1)
    wv[wv > 1] = 1
    wv[wv < 0] = 0
    wv = wv / np.max(wv)
    wv[wv == 1] = 0.99
    with np.errstate(divide="ignore"):
        wv = np.log(wv / (1 - wv)) + 0.5
    wv[np.isinf(wv) + wv > 1] = 1
    wv[wv < 0] = 0
    return wv * np.array(C)


def _adaptor_ref(inp):
    x = np.asarray(inp, np.float64)[0].T          # (n, d)
    w = _contra_ref(x)
    w = w / w.sum()
    return np.sum(x.T * w, axis=1, keepdims=True)  # (d, 1)


# --------------------------- main ---------------------------------------------

if __name__ == "__main__":
    # n_clients must be > 20 (CONTRA slices temp[:-20]); d=1024, n=32 keeps it small.
    d, n = 1024, 32
    key = jax.random.PRNGKey(0)
    inp = jax.random.normal(key, (1, d, n), dtype=jnp.float32)
    inp_np = np.asarray(inp)

    ref_f32_in = _adaptor_ref(inp_np)
    # Reference evaluated on the bf16-rounded input: exactly the values the
    # default bf16-streaming kernels consume.
    inp_bf16_np = np.asarray(inp.astype(jnp.bfloat16).astype(jnp.float32))
    ref_bf16_in = _adaptor_ref(inp_bf16_np)

    # 1) Fused single-kernel path, f32 streaming (strict check vs float64 ref).
    out_f32, att_f32 = net_forward(inp, stream_dtype=jnp.float32)
    out_f32 = jax.block_until_ready(out_f32)
    assert out_f32.shape == (d, 1)
    assert np.all(np.isfinite(np.asarray(out_f32)))
    np.testing.assert_allclose(np.asarray(out_f32), ref_f32_in, atol=2e-3, rtol=2e-3)

    # 2) Fused path with the default bf16 streaming (perf config).
    out_bf16, att_bf16 = net_forward(inp)
    out_bf16 = jax.block_until_ready(out_bf16)
    np.testing.assert_allclose(np.asarray(out_bf16), ref_bf16_in, atol=2e-3, rtol=2e-3)

    # 3) Tiled fallback path (forced): exercises the Gram-accumulator grid and
    #    the lane-dense weighted-sum kernel with bf16 streaming.
    out_tiled, att_tiled = net_forward(inp, force_tiled=True, tile_d=256)
    out_tiled = jax.block_until_ready(out_tiled)
    np.testing.assert_allclose(np.asarray(out_tiled), ref_bf16_in, atol=2e-3, rtol=2e-3)

    assert isinstance(att_f32, list) and isinstance(att_bf16, list) and isinstance(att_tiled, list)
    print("KERNEL_OK")
</pallas_src>

<mosaic_0001>
module attributes {stable_mosaic.version = 11 : i64} {
  func.func @_contra_fused_kernel(%arg0: memref<1024x32xf32, #tpu.memory_space<vmem>>, %arg1: memref<1x1024xf32, #tpu.memory_space<vmem>>, %arg2: memref<1x32xf32, #tpu.memory_space<vmem>>) attributes {dimension_semantics = [], scalar_prefetch = 0 : i64, scratch_operands = 0 : i64, tpu.core_type = #tpu.core_type<tc>} {
    %c0 = arith.constant 0 : index
    %c0_0 = arith.constant 0 : index
    %0 = vector.load %arg0[%c0, %c0_0] : memref<1024x32xf32, #tpu.memory_space<vmem>>, vector<1024x32xf32>
    %cst = arith.constant dense<0.000000e+00> : vector<32x32xf32>
    %1 = tpu.matmul %0, %0, %cst {dimension_numbers = #tpu.dot_dimension_numbers<[0], [0], [1], [1], [0, 1, 1, 1], [], []>} : vector<1024x32xf32>, vector<1024x32xf32>, vector<32x32xf32> -> vector<32x32xf32>
    %2 = tpu.iota {dimensions = array<i32: 0>} : vector<32x32xi32>
    %3 = tpu.iota {dimensions = array<i32: 1>} : vector<32x32xi32>
    %4 = arith.cmpi eq, %2, %3 : vector<32x32xi32>
    %5 = arith.extui %4 : vector<32x32xi1> to vector<32x32xi32>
    %6 = arith.sitofp %5 : vector<32x32xi32> to vector<32x32xf32>
    %7 = arith.mulf %1, %6 : vector<32x32xf32>
    %cst_1 = arith.constant dense<0.000000e+00> : vector<32xf32>
    %8 = vector.multi_reduction <add>, %7, %cst_1 [1] : vector<32x32xf32> to vector<32xf32>
    %9 = vector.shape_cast %8 : vector<32xf32> to vector<32x1xf32>
    %10 = arith.mulf %1, %6 : vector<32x32xf32>
    %cst_2 = arith.constant dense<0.000000e+00> : vector<32xf32>
    %11 = vector.multi_reduction <add>, %10, %cst_2 [0] : vector<32x32xf32> to vector<32xf32>
    %12 = vector.shape_cast %11 : vector<32xf32> to vector<1x32xf32>
    %cst_3 = arith.constant 1.000000e-30 : f32
    %13 = vector.broadcast %cst_3 : f32 to vector<32x1xf32>
    %14 = arith.maximumf %9, %13 : vector<32x1xf32>
    %15 = math.rsqrt %14 : vector<32x1xf32>
    %cst_4 = arith.constant 1.000000e-30 : f32
    %16 = vector.broadcast %cst_4 : f32 to vector<1x32xf32>
    %17 = arith.maximumf %12, %16 : vector<1x32xf32>
    %18 = math.rsqrt %17 : vector<1x32xf32>
    %19 = vector.broadcast %15 : vector<32x1xf32> to vector<32x32xf32>
    %20 = arith.mulf %1, %19 : vector<32x32xf32>
    %21 = vector.broadcast %18 : vector<1x32xf32> to vector<32x32xf32>
    %22 = arith.mulf %20, %21 : vector<32x32xf32>
    %23 = arith.subf %22, %6 : vector<32x32xf32>
    %cst_5 = arith.constant dense<0.000000e+00> : vector<32xf32>
    %24 = vector.multi_reduction <add>, %23, %cst_5 [0] : vector<32x32xf32> to vector<32xf32>
    %25 = vector.shape_cast %24 : vector<32xf32> to vector<1x32xf32>
    %cst_6 = arith.constant 3.200000e+01 : f32
    %26 = vector.broadcast %cst_6 : f32 to vector<1x32xf32>
    %27 = arith.divf %25, %26 : vector<1x32xf32>
    %cst_7 = arith.constant dense<0.000000e+00> : vector<32xf32>
    %28 = vector.multi_reduction <add>, %23, %cst_7 [1] : vector<32x32xf32> to vector<32xf32>
    %29 = vector.shape_cast %28 : vector<32xf32> to vector<32x1xf32>
    %cst_8 = arith.constant 3.200000e+01 : f32
    %30 = vector.broadcast %cst_8 : f32 to vector<32x1xf32>
    %31 = arith.divf %29, %30 : vector<32x1xf32>
    %cst_9 = arith.constant 5.000000e-02 : f32
    %32 = vector.broadcast %cst_9 : f32 to vector<1x32xf32>
    %33 = arith.cmpf ole, %27, %32 : vector<1x32xf32>
    %34 = arith.extui %33 : vector<1x32xi1> to vector<1x32xi32>
    %35 = arith.sitofp %34 : vector<1x32xi32> to vector<1x32xf32>
    %cst_10 = arith.constant dense<0.000000e+00> : vector<1xf32>
    %36 = vector.multi_reduction <add>, %35, %cst_10 [1] : vector<1x32xf32> to vector<1xf32>
    %37 = vector.shape_cast %36 : vector<1xf32> to vector<1x1xf32>
    %cst_11 = arith.constant 1.000000e+01 : f32
    %38 = vector.broadcast %cst_11 : f32 to vector<1x1xf32>
    %39 = arith.cmpf olt, %37, %38 : vector<1x1xf32>
    %cst_12 = arith.constant 1.000000e+00 : f32
    %40 = vector.broadcast %cst_12 : f32 to vector<1x32xf32>
    %41 = vector.shape_cast %39 : vector<1x1xi1> to vector<1x1xi1>
    %42 = vector.broadcast %41 : vector<1x1xi1> to vector<1x32xi1>
    %43 = arith.select %42, %40, %35 : vector<1x32xi1>, vector<1x32xf32>
    %44 = vector.broadcast %27 : vector<1x32xf32> to vector<32x32xf32>
    %45 = vector.broadcast %31 : vector<32x1xf32> to vector<32x32xf32>
    %46 = arith.cmpf olt, %44, %45 : vector<32x32xf32>
    %47 = vector.broadcast %27 : vector<1x32xf32> to vector<32x32xf32>
    %48 = vector.broadcast %31 : vector<32x1xf32> to vector<32x32xf32>
    %49 = arith.divf %47, %48 : vector<32x32xf32>
    %cst_13 = arith.constant 1.000000e+00 : f32
    %50 = vector.broadcast %cst_13 : f32 to vector<32x32xf32>
    %51 = arith.select %46, %49, %50 : vector<32x32xi1>, vector<32x32xf32>
    %52 = arith.mulf %23, %51 : vector<32x32xf32>
    %cst_14 = arith.constant dense<0xFF800000> : vector<32xf32>
    %53 = vector.multi_reduction <maximumf>, %52, %cst_14 [0] : vector<32x32xf32> to vector<32xf32>
    %54 = vector.shape_cast %53 : vector<32xf32> to vector<1x32xf32>
    %cst_15 = arith.constant 1.000000e+00 : f32
    %55 = vector.broadcast %cst_15 : f32 to vector<1x32xf32>
    %56 = arith.subf %55, %54 : vector<1x32xf32>
    %cst_16 = arith.constant 0.000000e+00 : f32
    %cst_17 = arith.constant 1.000000e+00 : f32
    %57 = vector.broadcast %cst_16 : f32 to vector<1x32xf32>
    %58 = arith.maximumf %57, %56 : vector<1x32xf32>
    %59 = vector.broadcast %cst_17 : f32 to vector<1x32xf32>
    %60 = arith.minimumf %59, %58 : vector<1x32xf32>
    %cst_18 = arith.constant dense<0xFF800000> : vector<1xf32>
    %61 = vector.multi_reduction <maximumf>, %60, %cst_18 [1] : vector<1x32xf32> to vector<1xf32>
    %62 = vector.shape_cast %61 : vector<1xf32> to vector<1x1xf32>
    %63 = vector.broadcast %62 : vector<1x1xf32> to vector<1x32xf32>
    %64 = arith.divf %60, %63 : vector<1x32xf32>
    %cst_19 = arith.constant 1.000000e+00 : f32
    %65 = vector.broadcast %cst_19 : f32 to vector<1x32xf32>
    %66 = arith.cmpf oeq, %64, %65 : vector<1x32xf32>
    %cst_20 = arith.constant 9.900000e-01 : f32
    %67 = vector.broadcast %cst_20 : f32 to vector<1x32xf32>
    %68 = arith.select %66, %67, %64 : vector<1x32xi1>, vector<1x32xf32>
    %cst_21 = arith.constant 1.000000e+00 : f32
    %69 = vector.broadcast %cst_21 : f32 to vector<1x32xf32>
    %70 = arith.subf %69, %68 : vector<1x32xf32>
    %71 = arith.divf %68, %70 : vector<1x32xf32>
    %72 = math.log %71 : vector<1x32xf32>
    %cst_22 = arith.constant 5.000000e-01 : f32
    %73 = vector.broadcast %cst_22 : f32 to vector<1x32xf32>
    %74 = arith.addf %72, %73 : vector<1x32xf32>
    %75 = math.absf %74 : vector<1x32xf32>
    %cst_23 = arith.constant 0x7F800000 : f32
    %76 = vector.broadcast %cst_23 : f32 to vector<1x32xf32>
    %77 = arith.cmpf oeq, %75, %76 : vector<1x32xf32>
    %78 = arith.extui %77 : vector<1x32xi1> to vector<1x32xi32>
    %79 = arith.sitofp %78 : vector<1x32xi32> to vector<1x32xf32>
    %80 = arith.addf %79, %74 : vector<1x32xf32>
    %cst_24 = arith.constant 1.000000e+00 : f32
    %81 = vector.broadcast %cst_24 : f32 to vector<1x32xf32>
    %82 = arith.cmpf ogt, %80, %81 : vector<1x32xf32>
    %cst_25 = arith.constant 1.000000e+00 : f32
    %83 = vector.broadcast %cst_25 : f32 to vector<1x32xf32>
    %84 = arith.select %82, %83, %74 : vector<1x32xi1>, vector<1x32xf32>
    %cst_26 = arith.constant 0.000000e+00 : f32
    %85 = vector.broadcast %cst_26 : f32 to vector<1x32xf32>
    %86 = arith.cmpf olt, %84, %85 : vector<1x32xf32>
    %cst_27 = arith.constant 0.000000e+00 : f32
    %87 = vector.broadcast %cst_27 : f32 to vector<1x32xf32>
    %88 = arith.select %86, %87, %84 : vector<1x32xi1>, vector<1x32xf32>
    %89 = arith.mulf %88, %43 : vector<1x32xf32>
    %cst_28 = arith.constant dense<0.000000e+00> : vector<1xf32>
    %90 = vector.multi_reduction <add>, %89, %cst_28 [1] : vector<1x32xf32> to vector<1xf32>
    %91 = vector.shape_cast %90 : vector<1xf32> to vector<1x1xf32>
    %92 = vector.broadcast %91 : vector<1x1xf32> to vector<1x32xf32>
    %93 = arith.divf %89, %92 : vector<1x32xf32>
    %c0_29 = arith.constant 0 : index
    %c0_30 = arith.constant 0 : index
    %94 = vector.load %arg2[%c0_29, %c0_30] : memref<1x32xf32, #tpu.memory_space<vmem>>, vector<1x32xf32>
    tpu.vector_store %arg2[%c0_29, %c0_30], %89 {strides = array<i32>} : memref<1x32xf32, #tpu.memory_space<vmem>>, vector<1x32xf32>,
    %cst_31 = arith.constant dense<0.000000e+00> : vector<1x1024xf32>
    %95 = tpu.matmul %93, %0, %cst_31 {dimension_numbers = #tpu.dot_dimension_numbers<[1], [1], [0], [0], [0, 0, 1, 0], [], []>} : vector<1x32xf32>, vector<1024x32xf32>, vector<1x1024xf32> -> vector<1x1024xf32>
    %c0_32 = arith.constant 0 : index
    %c0_33 = arith.constant 0 : index
    %96 = vector.load %arg1[%c0_32, %c0_33] : memref<1x1024xf32, #tpu.memory_space<vmem>>, vector<1x1024xf32>
    tpu.vector_store %arg1[%c0_32, %c0_33], %95 {strides = array<i32>} : memref<1x1024xf32, #tpu.memory_space<vmem>>, vector<1x1024xf32>,
    return
  }
}

</mosaic_0001>

<bundles_post_ra>
// kernel: _forward_jit.1
= control target key start
LH: loop header
LB: loop body
LE: loop exit
PB: predicated region body
PF: predicated region fallthrough
CT: control target
= control target key end

     0   :  { %8 = vsyncpa [#allocation3], 0  ;;  %s3837_s0 = inlined_call_operand.vmem [shape: f32[1024,32], index: 0, kind: input, shape index: {}]   ;;  %s3838_s1 = inlined_call_operand.hbm [shape: f32[1,1024], index: 1, kind: output, shape index: {0}]   ;;  %s3839_s2 = inlined_call_operand.hbm [shape: f32[1,32], index: 2, kind: output, shape index: {1}]  }
   0x1   :  { %v2490_v0 = vld [vmem:[%s3837_s0 + $0x100] sm:$0xff]  ;;  %v2512_v5 = vld [vmem:[%s3837_s0 + $0x108] sm:$0xff]  ;;  %v2538_v12 = vld [vmem:[%s3837_s0 + $0x110] sm:$0xff] }
   0x2   :  { %3900 = vst [vmem:[#allocation8_spill] sm:$0xff] %v2490_v0  ;;  %v2495_v1 = vld [vmem:[%s3837_s0 + $0x180] sm:$0xff]  ;;  %v2517_v6 = vld [vmem:[%s3837_s0 + $0x188] sm:$0xff]  ;;  %v2543_v13 = vld [vmem:[%s3837_s0 + $0x190] sm:$0xff] }
   0x3   :  { %3901 = vst [vmem:[#allocation9_spill] sm:$0xff] %v2495_v1  ;;  %v2500_v2 = vld [vmem:[%s3837_s0] sm:$0xff]  ;;  %v2170_v3 = vpack.i.bf16 %v2490_v0, %v2495_v1  ;;  %v2524_v8 = vld [vmem:[%s3837_s0 + $0x8] sm:$0xff]  ;;  %v2172_v10 = vpack.i.bf16 %v2512_v5, %v2517_v6  ;;  %v2548_v14 = vld [vmem:[%s3837_s0 + $0x10] sm:$0xff]  ;;  %v2174_v16 = vpack.i.bf16 %v2538_v12, %v2543_v13 }
   0x4   :  { %3902 = vst [vmem:[#allocation10_spill] sm:$0xff] %v2500_v2  ;;  %v2507_v4 = vld [vmem:[%s3837_s0 + $0x80] sm:$0xff]  ;;  %v2529_v9 = vld [vmem:[%s3837_s0 + $0x88] sm:$0xff]  ;;  %v2553_v15 = vld [vmem:[%s3837_s0 + $0x90] sm:$0xff] }
   0x5   :  { %3903 = vst [vmem:[#allocation11_spill] sm:$0xff] %v2507_v4  ;;  %v2118_v7 = vpack.i.bf16 %v2500_v2, %v2507_v4  ;;  %2171 = vxpose.xlu1.b32.start [1/16] (narrow) %v2170_v3, 32  ;;  %v2120_v11 = vpack.i.bf16 %v2524_v8, %v2529_v9  ;;  %v2122_v17 = vpack.i.bf16 %v2548_v14, %v2553_v15  ;;  %v2562_v18 = vld [vmem:[%s3837_s0 + $0x118] sm:$0xff]  ;;  %v2586_v24 = vld [vmem:[%s3837_s0 + $0x120] sm:$0xff]  ;;  %v2610_v30 = vld [vmem:[%s3837_s0 + $0x128] sm:$0xff] }
   0x6   :  { %v2567_v19 = vld [vmem:[%s3837_s0 + $0x198] sm:$0xff]  ;;  %v2591_v25 = vld [vmem:[%s3837_s0 + $0x1a0] sm:$0xff]  ;;  %3905 = vst [vmem:[#allocation13_spill] sm:$0xff] %v2610_v30  ;;  %v2615_v31 = vld [vmem:[%s3837_s0 + $0x1a8] sm:$0xff] }
   0x7   :  { %2119 = vxpose.xlu0.b32.start [1/16] (narrow) %v2118_v7, 32  ;;  %v2572_v20 = vld [vmem:[%s3837_s0 + $0x18] sm:$0xff]  ;;  %v2176_v22 = vpack.i.bf16 %v2562_v18, %v2567_v19  ;;  %v2596_v26 = vld [vmem:[%s3837_s0 + $0x20] sm:$0xff]  ;;  %v2178_v28 = vpack.i.bf16 %v2586_v24, %v2591_v25  ;;  %3906 = vst [vmem:[#allocation14_spill] sm:$0xff] %v2615_v31  ;;  %v2620_v32 = vld [vmem:[%s3837_s0 + $0x28] sm:$0xff]  ;;  %v2180_v34 = vpack.i.bf16 %v2610_v30, %v2615_v31 }
   0x8   :  { %v2577_v21 = vld [vmem:[%s3837_s0 + $0x98] sm:$0xff]  ;;  %v2601_v27 = vld [vmem:[%s3837_s0 + $0xa0] sm:$0xff]  ;;  %3907 = vst [vmem:[#allocation15_spill] sm:$0xff] %v2620_v32  ;;  %v2625_v33 = vld [vmem:[%s3837_s0 + $0xa8] sm:$0xff] }
   0x9   :  { %2173 = vxpose.xlu1.b32.cont [2/16] (narrow) %v2172_v10, 32  ;;  %v2124_v23 = vpack.i.bf16 %v2572_v20, %v2577_v21  ;;  %3904 = vst [vmem:[#allocation12_spill] sm:$0xff] %v2601_v27  ;;  %v2126_v29 = vpack.i.bf16 %v2596_v26, %v2601_v27  ;;  %3908 = vst [vmem:[#allocation16_spill] sm:$0xff] %v2625_v33  ;;  %v2632_v35 = vld [vmem:[%s3837_s0 + $0x130] sm:$0xff]  ;;  %v2128_v36 = vpack.i.bf16 %v2620_v32, %v2625_v33  ;;  %v2649_v39 = vld [vmem:[%s3837_s0 + $0x1f8] sm:$0xff] }
   0xa   :  { %3909 = vst [vmem:[#allocation17_spill] sm:$0xff] %v2632_v35  ;;  %v2639_v37 = vld [vmem:[%s3837_s0 + $0x1b0] sm:$0xff]  ;;  %3912 = vst [vmem:[#allocation20_spill] sm:$0xff] %v2649_v39  ;;  %v2659_v41 = vld [vmem:[%s3837_s0 + $0x178] sm:$0xff]  ;;  %1846 = vmatprep.subr.mxu1 %v2649_v39 }
   0xb   :  { %2121 = vxpose.xlu0.b32.cont [2/16] (narrow) %v2120_v11, 32  ;;  %3910 = vst [vmem:[#allocation18_spill] sm:$0xff] %v2639_v37  ;;  %v2644_v38 = vld [vmem:[%s3837_s0 + $0x30] sm:$0xff]  ;;  %3914 = vst [vmem:[#allocation22_spill] sm:$0xff] %v2659_v41  ;;  %v2664_v42 = vld [vmem:[%s3837_s0 + $0xf8] sm:$0xff]  ;;  %1847 = vmatpush3.msra.mxu1 %v2659_v41  ;;  %v2182_v44 = vpack.i.bf16 %v2632_v35, %v2639_v37 }
   0xc   :  { %3911 = vst [vmem:[#allocation19_spill] sm:$0xff] %v2644_v38  ;;  %v2654_v40 = vld [vmem:[%s3837_s0 + $0xb0] sm:$0xff]  ;;  %3915 = vst [vmem:[#allocation23_spill] sm:$0xff] %v2664_v42  ;;  %v2670_v43 = vld [vmem:[%s3837_s0 + $0x78] sm:$0xff]  ;;  %1802 = vmatprep.subr.mxu0 %v2664_v42 }
   0xd   :  { %2175 = vxpose.xlu1.b32.cont [3/16] (narrow) %v2174_v16, 32  ;;  %3913 = vst [vmem:[#allocation21_spill] sm:$0xff] %v2654_v40  ;;  %3916 = vst [vmem:[#allocation24_spill] sm:$0xff] %v2670_v43  ;;  %v2679_v45 = vld [vmem:[%s3837_s0 + $0x138] sm:$0xff]  ;;  %v2689_v47 = vld [vmem:[%s3837_s0 + $0xf0] sm:$0xff]  ;;  %1803 = vmatpush3.msra.mxu0 %v2670_v43  ;;  %v2130_v48 = vpack.i.bf16 %v2644_v38, %v2654_v40 }
   0xe   :  { %3917 = vst [vmem:[#allocation25_spill] sm:$0xff] %v2679_v45  ;;  %v2684_v46 = vld [vmem:[%s3837_s0 + $0x1b8] sm:$0xff]  ;;  %3919 = vst [vmem:[#allocation27_spill] sm:$0xff] %v2689_v47  ;;  %v2702_v50 = vld [vmem:[%s3837_s0 + $0x1f0] sm:$0xff]  ;;  %1804 = vmatprep.subr.mxu0 %v2689_v47 }
   0xf   :  { %2123 = vxpose.xlu0.b32.cont [3/16] (narrow) %v2122_v17, 32  ;;  %3918 = vst [vmem:[#allocation26_spill] sm:$0xff] %v2684_v46  ;;  %v2697_v49 = vld [vmem:[%s3837_s0 + $0x38] sm:$0xff]  ;;  %3921 = vst [vmem:[#allocation29_spill] sm:$0xff] %v2702_v50  ;;  %v2707_v51 = vld [vmem:[%s3837_s0 + $0x70] sm:$0xff]  ;;  %1848 = vmatprep.subr.mxu1 %v2702_v50  ;;  %v2184_v56 = vpack.i.bf16 %v2679_v45, %v2684_v46 }
  0x10   :  { %3920 = vst [vmem:[#allocation28_spill] sm:$0xff] %v2697_v49  ;;  %3922 = vst [vmem:[#allocation30_spill] sm:$0xff] %v2707_v51  ;;  %v2713_v52 = vld [vmem:[%s3837_s0 + $0xb8] sm:$0xff]  ;;  %v2718_v53 = vld [vmem:[%s3837_s0 + $0xe8] sm:$0xff]  ;;  %1805 = vmatpush3.msra.mxu0 %v2707_v51 }
  0x11   :  { %2177 = vxpose.xlu1.b32.cont [4/16] (narrow) %v2176_v22, 32  ;;  %3923 = vst [vmem:[#allocation31_spill] sm:$0xff] %v2713_v52  ;;  %3924 = vst [vmem:[#allocation32_spill] sm:$0xff] %v2718_v53  ;;  %v2723_v54 = vld [vmem:[%s3837_s0 + $0x170] sm:$0xff]  ;;  %v2730_v55 = vld [vmem:[%s3837_s0 + $0x1e8] sm:$0xff]  ;;  %1806 = vmatprep.subr.mxu0 %v2718_v53  ;;  %v2132_v60 = vpack.i.bf16 %v2697_v49, %v2713_v52 }
  0x12   :  { %3925 = vst [vmem:[#allocation33_spill] sm:$0xff] %v2723_v54  ;;  %3926 = vst [vmem:[#allocation34_spill] sm:$0xff] %v2730_v55  ;;  %1849 = vmatpush3.msra.mxu1 %v2723_v54  ;;  %v2739_v57 = vld [vmem:[%s3837_s0 + $0x140] sm:$0xff]  ;;  %v2749_v59 = vld [vmem:[%s3837_s0 + $0x68] sm:$0xff] }
  0x13   :  { %2125 = vxpose.xlu0.b32.cont [4/16] (narrow) %v2124_v23, 32  ;;  %3927 = vst [vmem:[#allocation35_spill] sm:$0xff] %v2739_v57  ;;  %v2744_v58 = vld [vmem:[%s3837_s0 + $0x1c0] sm:$0xff]  ;;  %3929 = vst [vmem:[#allocation37_spill] sm:$0xff] %v2749_v59  ;;  %1850 = vmatprep.subr.mxu1 %v2730_v55  ;;  %v2767_v63 = vld [vmem:[%s3837_s0 + $0x168] sm:$0xff] }
  0x14   :  { %3928 = vst [vmem:[#allocation36_spill] sm:$0xff] %v2744_v58  ;;  %v2757_v61 = vld [vmem:[%s3837_s0 + $0x40] sm:$0xff]  ;;  %3932 = vst [vmem:[#allocation40_spill] sm:$0xff] %v2767_v63  ;;  %1807 = vmatpush3.msra.mxu0 %v2749_v59  ;;  %1851 = vmatpush3.msra.mxu1 %v2767_v63  ;;  %v2186_v16 = vpack.i.bf16 %v2739_v57, %v2744_v58  ;;  %v2799_v17 = vld [vmem:[%s3837_s0 + $0x148] sm:$0xff] }
  0x15   :  { %2179 = vxpose.xlu1.b32.cont [5/16] (narrow) %v2178_v28, 32  ;;  %3930 = vst [vmem:[#allocation38_spill] sm:$0xff] %v2757_v61  ;;  %v2762_v62 = vld [vmem:[%s3837_s0 + $0xe0] sm:$0xff]  ;;  %3937 = vst [vmem:[#allocation45_spill] sm:$0xff] %v2799_v17  ;;  %v2804_v22 = vld [vmem:[%s3837_s0 + $0x1c8] sm:$0xff] }
  0x16   :  { %3931 = vst [vmem:[#allocation39_spill] sm:$0xff] %v2762_v62  ;;  %v2773_v3 = vld [vmem:[%s3837_s0 + $0xc0] sm:$0xff]  ;;  %1808 = vmatprep.subr.mxu0 %v2762_v62  ;;  %3938 = vst [vmem:[#allocation46_spill] sm:$0xff] %v2804_v22  ;;  %v2809_v23 = vld [vmem:[%s3837_s0 + $0xd8] sm:$0xff]  ;;  %v2188_v0 = vpack.i.bf16 %v2799_v17, %v2804_v22 }
  0x17   :  { %2127 = vxpose.xlu0.b32.cont [5/16] (narrow) %v2126_v29, 32  ;;  %3933 = vst [vmem:[#allocation41_spill] sm:$0xff] %v2773_v3  ;;  %v2778_v7 = vld [vmem:[%s3837_s0 + $0x1e0] sm:$0xff]  ;;  %3939 = vst [vmem:[#allocation47_spill] sm:$0xff] %v2809_v23  ;;  %v2134_v28 = vpack.i.bf16 %v2757_v61, %v2773_v3  ;;  %v2817_v29 = vld [vmem:[%s3837_s0 + $0x48] sm:$0xff] }
  0x18   :  { %3934 = vst [vmem:[#allocation42_spill] sm:$0xff] %v2778_v7  ;;  %v2783_v10 = vld [vmem:[%s3837_s0 + $0x60] sm:$0xff]  ;;  %1852 = vmatprep.subr.mxu1 %v2778_v7  ;;  %3940 = vst [vmem:[#allocation48_spill] sm:$0xff] %v2817_v29  ;;  %v2859_v2 = vld [vmem:[%s3837_s0 + $0x50] sm:$0xff] }
  0x19   :  { %2181 = vxpose.xlu1.b32.cont [6/16] (narrow) %v2180_v34, 32  ;;  %3935 = vst [vmem:[#allocation43_spill] sm:$0xff] %v2783_v10  ;;  %v2790_v11 = vld [vmem:[%s3837_s0 + $0x160] sm:$0xff]  ;;  %1809 = vmatpush3.msra.mxu0 %v2783_v10  ;;  %v2822_v34 = vld [vmem:[%s3837_s0 + $0x1d8] sm:$0xff]  ;;  %3947 = vst [vmem:[#allocation55_spill] sm:$0xff] %v2859_v2 }
  0x1a   :  { %3936 = vst [vmem:[#allocation44_spill] sm:$0xff] %v2790_v11  ;;  %1853 = vmatpush3.msra.mxu1 %v2790_v11  ;;  %3941 = vst [vmem:[#allocation49_spill] sm:$0xff] %v2822_v34  ;;  %1810 = vmatprep.subr.mxu0 %v2809_v23  ;;  %v2867_v4 = vld [vmem:[%s3837_s0 + $0x150] sm:$0xff] }
  0x1b   :  { %2129 = vxpose.xlu0.b32.cont [6/16] (narrow) %v2128_v36, 32  ;;  %v2827_v36 = vld [vmem:[%s3837_s0 + $0x58] sm:$0xff]  ;;  %1854 = vmatprep.subr.mxu1 %v2822_v34  ;;  %3948 = vst [vmem:[#allocation56_spill] sm:$0xff] %v2867_v4 }
  0x1c   :  { %3942 = vst [vmem:[#allocation50_spill] sm:$0xff] %v2827_v36  ;;  %1811 = vmatpush3.msra.mxu0 %v2827_v36 }
  0x1d   :  { %2183 = vxpose.xlu1.b32.cont [7/16] (narrow) %v2182_v44, 32  ;;  %v2833_v44 = vld [vmem:[%s3837_s0 + $0xc8] sm:$0xff] }
  0x1e   :  { %3943 = vst [vmem:[#allocation51_spill] sm:$0xff] %v2833_v44  ;;  %v2136_v1 = vpack.i.bf16 %v2817_v29, %v2833_v44 }
  0x1f   :  { %2131 = vxpose.xlu0.b32.cont [7/16] (narrow) %v2130_v48, 32  ;;  %v2838_v48 = vld [vmem:[%s3837_s0 + $0xd0] sm:$0xff] }
  0x20   :  { %3944 = vst [vmem:[#allocation52_spill] sm:$0xff] %v2838_v48  ;;  %1812 = vmatprep.subr.mxu0 %v2838_v48 }
  0x21   :  { %2185 = vxpose.xlu1.b32.cont [8/16] (narrow) %v2184_v56, 32  ;;  %v2843_v56 = vld [vmem:[%s3837_s0 + $0x158] sm:$0xff]  ;;  %1813 = vmatpush3.msra.mxu0 %v2859_v2 }
  0x22   :  { %3945 = vst [vmem:[#allocation53_spill] sm:$0xff] %v2843_v56  ;;  %1855 = vmatpush3.msra.mxu1 %v2843_v56  ;;  %1814 = vmatprep.subr.mxu0 %v2833_v44 }
  0x23   :  { %2133 = vxpose.xlu0.b32.cont [8/16] (narrow) %v2132_v60, 32  ;;  %v2850_v60 = vld [vmem:[%s3837_s0 + $0x1d0] sm:$0xff]  ;;  %1815 = vmatpush3.msra.mxu0 %v2817_v29 }
  0x24   :  { %3946 = vst [vmem:[#allocation54_spill] sm:$0xff] %v2850_v60  ;;  %1856 = vmatprep.subr.mxu1 %v2850_v60  ;;  %1816 = vmatprep.subr.mxu0 %v2773_v3 }
  0x25   :  { %2187 = vxpose.xlu1.b32.cont [9/16] (narrow) %v2186_v16, 32  ;;  %1857 = vmatpush3.msra.mxu1 %v2867_v4  ;;  %v2190_v16 = vpack.i.bf16 %v2867_v4, %v2850_v60 }
  0x26   :  { %1858 = vmatprep.subr.mxu1 %v2804_v22  ;;  %1817 = vmatpush3.msra.mxu0 %v2757_v61 }
  0x27   :  { %2135 = vxpose.xlu0.b32.cont [9/16] (narrow) %v2134_v28, 32  ;;  %1859 = vmatpush3.msra.mxu1 %v2799_v17  ;;  %v2138_v28 = vpack.i.bf16 %v2859_v2, %v2838_v48 }
  0x28   :  { %1860 = vmatprep.subr.mxu1 %v2744_v58  ;;  %1818 = vmatprep.subr.mxu0 %v2713_v52 }
  0x29   :  { %2189 = vxpose.xlu1.b32.cont [10/16] (narrow) %v2188_v0, 32  ;;  %1861 = vmatpush3.msra.mxu1 %v2739_v57 }
  0x2b   :  { %2137 = vxpose.xlu0.b32.cont [10/16] (narrow) %v2136_v1, 32 }
  0x2c   :  { %9 = vsyncpa [#allocation5], 0  ;;  %v2192_v0 = vpack.i.bf16 %v2843_v56, %v2822_v34  ;;  %1862 = vmatprep.subr.mxu1 %v2684_v46  ;;  %v2140_v1 = vpack.i.bf16 %v2827_v36, %v2809_v23  ;;  %1819 = vmatpush3.msra.mxu0 %v2697_v49  ;;  %v3094_v46 = vld [vmem:[%s3837_s0 + $0x330] sm:$0xff]  ;;  %v3118_v58 = vld [vmem:[%s3837_s0 + $0x338] sm:$0xff]  ;;  %vm759_vm0 = vcmask 261120   ;;  %vm904_vm15 = vcmask 253952  }
  0x2d   :  { %2191 = vxpose.xlu1.b32.cont [11/16] (narrow) %v2190_v16, 32  ;;  %1863 = vmatpush3.msra.mxu1 %v2679_v45  ;;  %v2194_v16 = vpack.i.bf16 %v2790_v11, %v2778_v7  ;;  %v3099_v52 = vld [vmem:[%s3837_s0 + $0x3b0] sm:$0xff]  ;;  %v3123_v3 = vld [vmem:[%s3837_s0 + $0x3b8] sm:$0xff]  ;;  %v3142_v22 = vld [vmem:[%s3837_s0 + $0x340] sm:$0xff]  ;;  %s2469_s17 = smov [#allocation4]  }
  0x2e   :  { %1820 = vmatprep.subr.mxu0 %v2654_v40  ;;  %1864 = vmatprep.subr.mxu1 %v2639_v37  ;;  %v3070_v37 = vld [vmem:[%s3837_s0 + $0x328] sm:$0xff]  ;;  %v2286_v57 = vpack.i.bf16 %v3094_v46, %v3099_v52  ;;  %v2288_v17 = vpack.i.bf16 %v3118_v58, %v3123_v3  ;;  %v3147_v44 = vld [vmem:[%s3837_s0 + $0x3c0] sm:$0xff]  ;;  %v3190_v34 = vld [vmem:[%s3837_s0 + $0x350] sm:$0xff]  ;;  %s1652_s18 = sshll.u32 %s2469_s17, 4  ;;  %s1653_s18 = int_to_ptr.vmem [resolvable:$true] %s1652_s18 }
  0x2f   :  { %2139 = vxpose.xlu0.b32.cont [11/16] (narrow) %v2138_v28, 32  ;;  %1821 = vmatpush3.msra.mxu0 %v2644_v38  ;;  %v2142_v28 = vpack.i.bf16 %v2783_v10, %v2762_v62  ;;  %v3075_v40 = vld [vmem:[%s3837_s0 + $0x3a8] sm:$0xff]  ;;  %v2290_v4 = vpack.i.bf16 %v3142_v22, %v3147_v44  ;;  %v3195_v23 = vld [vmem:[%s3837_s0 + $0x3d0] sm:$0xff]  ;;  %v3214_v7 = vld [vmem:[%s3837_s0 + $0x358] sm:$0xff]  ;;  %s2424_s19 = scalar_lea.vmem %s1653_s18, 16  ;;  %s2428_s20 = scalar_lea.vmem %s1653_s18, 32 }
  0x30   :  { %1865 = vmatpush3.msra.mxu1 %v2632_v35  ;;  %1822 = vmatprep.subr.mxu0 %v2625_v33  ;;  %v3051_v33 = vld [vmem:[%s3837_s0 + $0x3a0] sm:$0xff]  ;;  %v2284_v45 = vpack.i.bf16 %v3070_v37, %v3075_v40  ;;  %v3166_v60 = vld [vmem:[%s3837_s0 + $0x348] sm:$0xff]  ;;  %v2294_v11 = vpack.i.bf16 %v3190_v34, %v3195_v23  ;;  %v3219_v62 = vld [vmem:[%s3837_s0 + $0x3d8] sm:$0xff]  ;;  %p2425_p0 = scmp.ne.s32.totalorder %s1653_s18, %s2424_s19  ;;  %p2429_p1 = scmp.lt.s32.totalorder %s1653_s18, %s1653_s18 }
  0x31   :  { %2193 = vxpose.xlu1.b32.cont [12/16] (narrow) %v2192_v0, 32  ;;  %1866 = vmatprep.subr.mxu1 %v2615_v31  ;;  %v2196_v0 = vpack.i.bf16 %v2767_v63, %v2730_v55  ;;  %v3046_v31 = vld [vmem:[%s3837_s0 + $0x320] sm:$0xff]  ;;  %v3171_v48 = vld [vmem:[%s3837_s0 + $0x3c8] sm:$0xff]  ;;  %v2296_v63 = vpack.i.bf16 %v3214_v7, %v3219_v62  ;;  %p2430_p2 = scmp.lt.s32.totalorder %s2428_s20, %s2424_s19 }
  0x32   :  { %1823 = vmatpush3.msra.mxu0 %v2620_v32  ;;  %1867 = vmatpush3.msra.mxu1 %v2610_v30  ;;  %v2282_v35 = vpack.i.bf16 %v3046_v31, %v3051_v33  ;;  %v2292_v56 = vpack.i.bf16 %v3166_v60, %v3171_v48  ;;  %v120_v55 = vld [vmem:[%s3837_s0 + $0x360] sm:$0xff] }
  0x33   :  { %2141 = vxpose.xlu0.b32.cont [12/16] (narrow) %v2140_v1, 32  ;;  %1824 = vmatprep.subr.mxu0 %v2601_v27  ;;  %v2144_v1 = vpack.i.bf16 %v2749_v59, %v2718_v53  ;;  %v3027_v27 = vld [vmem:[%s3837_s0 + $0x398] sm:$0xff]  ;;  %v136_v53 = vld [vmem:[%s3837_s0 + $0x3e0] sm:$0xff]  ;;  %p2431_p3 = por %p2430_p2, %p2429_p1 }
  0x34   :  { %1868 = vmatprep.subr.mxu1 %v2591_v25  ;;  %1825 = vmatpush3.msra.mxu0 %v2596_v26  ;;  %v2146_v25 = vpack.i.bf16 %v2707_v51, %v2689_v47  ;;  %v2967_v26 = vld [vmem:[%s3837_s0 + $0x308] sm:$0xff] }
  0x35   :  { %2195 = vxpose.xlu1.b32.cont [13/16] (narrow) %v2194_v16, 32  ;;  %1869 = vmatpush3.msra.mxu1 %v2586_v24  ;;  %v2198_v16 = vpack.i.bf16 %v2723_v54, %v2702_v50  ;;  %v3956_v24 = vld [vmem:[#allocation8_spill] sm:$0xff]  ;;  %v88_v54 = vld [vmem:[%s3837_s0 + $0x260] sm:$0xff]  ;;  %p2432_p4 = pnand %p2431_p3, %p2425_p0 }
  0x36   :  { %1826 = vmatprep.subr.mxu0 %v2577_v21  ;;  %1870 = vmatprep.subr.mxu1 %v2567_v19  ;;  %v2200_v19 = vpack.i.bf16 %v2659_v41, %v2649_v39  ;;  %v2959_v21 = vld [vmem:[%s3837_s0 + $0x2f8] sm:$0xff]  ;;  %v121_v50 = vld [vmem:[%s3837_s0 + $0x368] sm:$0xff]  ;;  %v3271_v39 = vld [vmem:[%s3837_s0 + $0x370] sm:$0xff] }
  0x37   :  { %2143 = vxpose.xlu0.b32.cont [13/16] (narrow) %v2142_v28, 32  ;;  %1827 = vmatpush3.msra.mxu0 %v2572_v20  ;;  %v3955_v20 = vld [vmem:[#allocation10_spill] sm:$0xff]  ;;  %v2972_v28 = vld [vmem:[%s3837_s0 + $0x388] sm:$0xff] }
  0x38   :  { %1871 = vmatpush3.msra.mxu1 %v2562_v18  ;;  %1828 = vmatprep.subr.mxu0 %v2553_v15  ;;  %v2148_v18 = vpack.i.bf16 %v2670_v43, %v2664_v42  ;;  %v3954_v15 = vld [vmem:[#allocation9_spill] sm:$0xff]  ;;  %v3253_v47 = vld [vmem:[%s3837_s0 + $0x3e8] sm:$0xff] }
  0x39   :  { %2197 = vxpose.xlu1.b32.cont [14/16] (narrow) %v2196_v0, 32  ;;  %1872 = vmatprep.subr.mxu1 %v2543_v13  ;;  %v2932_v13 = vld [vmem:[%s3837_s0 + $0x300] sm:$0xff]  ;;  %3958 = vst [vmem:[#allocation9_spill] sm:$0xff] %v2972_v28  ;;  %v2977_v0 = vld [vmem:[%s3837_s0 + $0x3f8] sm:$0xff]  ;;  %v3258_v41 = vld [vmem:[%s3837_s0 + $0x268] sm:$0xff] }
  0x3a   :  { %1829 = vmatpush3.msra.mxu0 %v2548_v14  ;;  %1873 = vmatpush3.msra.mxu1 %v2538_v12  ;;  %3949 = vst [vmem:[#allocation57_spill] sm:$0xff] %v2932_v13  ;;  %v2937_v12 = vld [vmem:[%s3837_s0 + $0x380] sm:$0xff]  ;;  %v3276_v42 = vld [vmem:[%s3837_s0 + $0x3f0] sm:$0xff] }
  0x3b   :  { %2145 = vxpose.xlu0.b32.cont [14/16] (narrow) %v2144_v1, 32  ;;  %1830 = vmatprep.subr.mxu0 %v2529_v9  ;;  %3950 = vst [vmem:[#allocation58_spill] sm:$0xff] %v2937_v12  ;;  %v2948_v9 = vld [vmem:[%s3837_s0 + $0x280] sm:$0xff]  ;;  %v2983_v1 = vld [vmem:[%s3837_s0 + $0x208] sm:$0xff] }
  0x3c   :  { %1874 = vmatprep.subr.mxu1 %v2517_v6  ;;  %1831 = vmatpush3.msra.mxu0 %v2524_v8  ;;  %v2943_v6 = vld [vmem:[%s3837_s0 + $0x200] sm:$0xff]  ;;  %3952 = vst [vmem:[#allocation60_spill] sm:$0xff] %v2948_v9  ;;  %v2274_v8 = vpack.i.bf16 %v2932_v13, %v2937_v12  ;;  %3959 = vst [vmem:[#allocation10_spill] sm:$0xff] %v2983_v1  ;;  %v2302_v13 = vpack.i.bf16 %v3271_v39, %v3276_v42  ;;  %v3295_v12 = vld [vmem:[%s3837_s0 + $0x378] sm:$0xff] }
  0x3d   :  { %2199 = vxpose.xlu1.b32.cont [15/16] (narrow) %v2198_v16, 32  ;;  %3951 = vst [vmem:[#allocation59_spill] sm:$0xff] %v2943_v6  ;;  %1875 = vmatpush3.msra.mxu1 %v2512_v5  ;;  %v3953_v14 = vld [vmem:[#allocation11_spill] sm:$0xff]  ;;  %v2222_v5 = vpack.i.bf16 %v2943_v6, %v2948_v9  ;;  %v3300_v9 = vld [vmem:[%s3837_s0 + $0x278] sm:$0xff] }
  0x3e   :  { %1832 = vmatprep.subr.mxu0 %v3953_v14  ;;  %1876 = vmatprep.subr.mxu1 %v3954_v15  ;;  %3957 = vst [vmem:[#allocation11_spill] sm:$0xff] %v2967_v26  ;;  %v2988_v16 = vld [vmem:[%s3837_s0 + $0x288] sm:$0xff]  ;;  %v3003_v14 = vld [vmem:[%s3837_s0 + $0x390] sm:$0xff] }
  0x3f   :  { %2147 = vxpose.xlu0.b32.cont [15/16] (narrow) %v2146_v25, 32  ;;  %1833 = vmatpush3.msra.mxu0 %v3955_v20  ;;  %3960 = vst [vmem:[#allocation8_spill] sm:$0xff] %v2988_v16  ;;  %v2276_v25 = vpack.i.bf16 %v2967_v26, %v2972_v28  ;;  %3962 = vst [vmem:[#allocation62_spill] sm:$0xff] %v3003_v14  ;;  %v3008_v15 = vld [vmem:[%s3837_s0 + $0x210] sm:$0xff] }
  0x40   :  { %1877 = vmatpush3.msra.mxu1 %v3956_v24  ;;  %1890 = vmatprep.subr.mxu0 %v2959_v21  ;;  %3963 = vst [vmem:[#allocation63_spill] sm:$0xff] %v3008_v15  ;;  %v3013_v20 = vld [vmem:[%s3837_s0 + $0x290] sm:$0xff] }
  0x41   :  { %2201 = vxpose.xlu1.b32.end [16/16] (narrow) %v2200_v19, 32  ;;  %1934 = vmatprep.subr.mxu1 %v2977_v0  ;;  %v2224_v19 = vpack.i.bf16 %v2983_v1, %v2988_v16  ;;  %v2226_v24 = vpack.i.bf16 %v3008_v15, %v3013_v20 }
  0x43   :  { %2149 = vxpose.xlu0.b32.end [16/16] (narrow) %v2148_v18, 32  ;;  %v2998_v18 = vld [vmem:[%s3837_s0 + $0x310] sm:$0xff] }
  0x44   :  { %3961 = vst [vmem:[#allocation61_spill] sm:$0xff] %v2998_v18 }
  0x45   :  { %2275 = vxpose.xlu1.b32.start [1/16] (narrow) %v2274_v8, 32  ;;  %v2278_v8 = vpack.i.bf16 %v2998_v18, %v3003_v14 }
  0x47   :  { %2223 = vxpose.xlu0.b32.start [1/16] (narrow) %v2222_v5, 32  ;;  %v3022_v5 = vld [vmem:[%s3837_s0 + $0x318] sm:$0xff] }
  0x48   :  { %v2280_v30 = vpack.i.bf16 %v3022_v5, %v3027_v27 }
  0x49   :  { %2277 = vxpose.xlu1.b32.cont [2/16] (narrow) %v2276_v25, 32  ;;  %v3032_v25 = vld [vmem:[%s3837_s0 + $0x218] sm:$0xff] }
  0x4b   :  { %2225 = vxpose.xlu0.b32.cont [2/16] (narrow) %v2224_v19, 32  ;;  %v3037_v19 = vld [vmem:[%s3837_s0 + $0x298] sm:$0xff] }
  0x4c   :  { %v2228_v32 = vpack.i.bf16 %v3032_v25, %v3037_v19 }
  0x4d   :  { %2279 = vxpose.xlu1.b32.cont [3/16] (narrow) %v2278_v8, 32  ;;  %v3056_v8 = vld [vmem:[%s3837_s0 + $0x220] sm:$0xff] }
  0x4f   :  { %2227 = vxpose.xlu0.b32.cont [3/16] (narrow) %v2226_v24, 32  ;;  %v3061_v24 = vld [vmem:[%s3837_s0 + $0x2a0] sm:$0xff] }
  0x50   :  { %v2230_v38 = vpack.i.bf16 %v3056_v8, %v3061_v24 }
  0x51   :  { %2281 = vxpose.xlu1.b32.cont [4/16] (narrow) %v2280_v30, 32  ;;  %v3080_v30 = vld [vmem:[%s3837_s0 + $0x228] sm:$0xff] }
  0x53   :  { %2229 = vxpose.xlu0.b32.cont [4/16] (narrow) %v2228_v32, 32  ;;  %v3085_v32 = vld [vmem:[%s3837_s0 + $0x2a8] sm:$0xff] }
  0x54   :  { %v2232_v49 = vpack.i.bf16 %v3080_v30, %v3085_v32 }
  0x55   :  { %2283 = vxpose.xlu1.b32.cont [5/16] (narrow) %v2282_v35, 32  ;;  %v3104_v35 = vld [vmem:[%s3837_s0 + $0x230] sm:$0xff] }
  0x57   :  { %2231 = vxpose.xlu0.b32.cont [5/16] (narrow) %v2230_v38, 32  ;;  %v3109_v38 = vld [vmem:[%s3837_s0 + $0x2b0] sm:$0xff] }
  0x58   :  { %v2234_v61 = vpack.i.bf16 %v3104_v35, %v3109_v38 }
  0x59   :  { %2285 = vxpose.xlu1.b32.cont [6/16] (narrow) %v2284_v45, 32  ;;  %v3128_v45 = vld [vmem:[%s3837_s0 + $0x238] sm:$0xff] }
  0x5b   :  { %2233 = vxpose.xlu0.b32.cont [6/16] (narrow) %v2232_v49, 32  ;;  %v3133_v49 = vld [vmem:[%s3837_s0 + $0x2b8] sm:$0xff] }
  0x5c   :  { %v2236_v29 = vpack.i.bf16 %v3128_v45, %v3133_v49 }
  0x5d   :  { %2287 = vxpose.xlu1.b32.cont [7/16] (narrow) %v2286_v57, 32  ;;  %v3152_v57 = vld [vmem:[%s3837_s0 + $0x240] sm:$0xff] }
  0x5f   :  { %2235 = vxpose.xlu0.b32.cont [7/16] (narrow) %v2234_v61, 32  ;;  %v3157_v61 = vld [vmem:[%s3837_s0 + $0x2c0] sm:$0xff] }
  0x60   :  { %v2238_v2 = vpack.i.bf16 %v3152_v57, %v3157_v61 }
  0x61   :  { %2289 = vxpose.xlu1.b32.cont [8/16] (narrow) %v2288_v17, 32  ;;  %v3176_v17 = vld [vmem:[%s3837_s0 + $0x248] sm:$0xff] }
  0x63   :  { %2237 = vxpose.xlu0.b32.cont [8/16] (narrow) %v2236_v29, 32  ;;  %v3181_v29 = vld [vmem:[%s3837_s0 + $0x2c8] sm:$0xff] }
  0x64   :  { %v2240_v36 = vpack.i.bf16 %v3176_v17, %v3181_v29 }
  0x65   :  { %2291 = vxpose.xlu1.b32.cont [9/16] (narrow) %v2290_v4, 32  ;;  %v3200_v4 = vld [vmem:[%s3837_s0 + $0x250] sm:$0xff] }
  0x67   :  { %2239 = vxpose.xlu0.b32.cont [9/16] (narrow) %v2238_v2, 32  ;;  %v3205_v2 = vld [vmem:[%s3837_s0 + $0x2d0] sm:$0xff] }
  0x68   :  { %v2242_v10 = vpack.i.bf16 %v3200_v4, %v3205_v2 }
  0x69   :  { %2293 = vxpose.xlu1.b32.cont [10/16] (narrow) %v2292_v56, 32  ;;  %v3224_v56 = vld [vmem:[%s3837_s0 + $0x258] sm:$0xff] }
  0x6b   :  { %2241 = vxpose.xlu0.b32.cont [10/16] (narrow) %v2240_v36, 32  ;;  %v3229_v36 = vld [vmem:[%s3837_s0 + $0x2d8] sm:$0xff] }
  0x6c   :  { %v2244_v59 = vpack.i.bf16 %v3224_v56, %v3229_v36 }
  0x6d   :  { %2295 = vxpose.xlu1.b32.cont [11/16] (narrow) %v2294_v11, 32  ;;  %v104_v11 = vld [vmem:[%s3837_s0 + $0x2e0] sm:$0xff] }
  0x6e   :  { %v2246_v51 = vpack.i.bf16 %v88_v54, %v104_v11 }
  0x6f   :  { %2243 = vxpose.xlu0.b32.cont [11/16] (narrow) %v2242_v10, 32  ;;  %v2298_v10 = vpack.i.bf16 %v120_v55, %v136_v53 }
  0x71   :  { %2297 = vxpose.xlu1.b32.cont [12/16] (narrow) %v2296_v63, 32  ;;  %v3263_v63 = vld [vmem:[%s3837_s0 + $0x2e8] sm:$0xff] }
  0x72   :  { %v2248_v43 = vpack.i.bf16 %v3258_v41, %v3263_v63 }
  0x73   :  { %2245 = vxpose.xlu0.b32.cont [12/16] (narrow) %v2244_v59, 32  ;;  %v2300_v59 = vpack.i.bf16 %v121_v50, %v3253_v47 }
  0x75   :  { %2299 = vxpose.xlu1.b32.cont [13/16] (narrow) %v2298_v10, 32  ;;  %v3281_v10 = vld [vmem:[%s3837_s0 + $0x270] sm:$0xff] }
  0x77   :  { %2247 = vxpose.xlu0.b32.cont [13/16] (narrow) %v2246_v51, 32  ;;  %v3286_v51 = vld [vmem:[%s3837_s0 + $0x2f0] sm:$0xff] }
  0x78   :  { %v2250_v6 = vpack.i.bf16 %v3281_v10, %v3286_v51 }
  0x79   :  { %2301 = vxpose.xlu1.b32.cont [14/16] (narrow) %v2300_v59, 32  ;;  %v2304_v59 = vpack.i.bf16 %v3295_v12, %v2977_v0 }
  0x7b   :  { %2249 = vxpose.xlu0.b32.cont [14/16] (narrow) %v2248_v43, 32  ;;  %v2252_v43 = vpack.i.bf16 %v3300_v9, %v2959_v21 }
  0x7d   :  { %2303 = vxpose.xlu1.b32.cont [15/16] (narrow) %v2302_v13, 32 }
  0x7f   :  { %2251 = vxpose.xlu0.b32.cont [15/16] (narrow) %v2250_v6, 32 }
  0x81   :  { %2305 = vxpose.xlu1.b32.end [16/16] (narrow) %v2304_v59, 32  ;;  %v2202_v26 = vpop.trf.xlu1 }
  0x82   :  { %v2203_v28 = vunpack.i.l.bf16 %v2202_v26  ;;  %v2206_v16 = vunpack.i.h.bf16 %v2202_v26 }
  0x83   :  { %2253 = vxpose.xlu0.b32.end [16/16] (narrow) %v2252_v43, 32  ;;  %v2150_v1 = vpop.trf.xlu0  ;;  %v3975_v43 = vld [vmem:[#allocation23_spill] sm:$0xff] }
  0x84   :  { %v2151_v18 = vunpack.i.l.bf16 %v2150_v1  ;;  %v2154_v15 = vunpack.i.h.bf16 %v2150_v1  ;;  %545 = vmatprep.mubr.f32.mxu1 %v2203_v28 }
  0x85   :  { %546 = vmatmul.mubr.f32.vlgmr.msra.gmra.mxu1 %v2206_v16  ;;  %v2207_v14 = vpop.trf.xlu1  ;;  %v3973_v16 = vld [vmem:[#allocation59_spill] sm:$0xff] }
  0x86   :  { %460 = vmatprep.mubr.f32.mxu0 %v2151_v18  ;;  %1935 = vmatpush3.msra.mxu1 %v3295_v12  ;;  %v3974_v18 = vld [vmem:[#allocation57_spill] sm:$0xff] }
  0x87   :  { %461 = vmatmul.mubr.f32.vlgmr.msra.gmra.mxu0 %v2154_v15  ;;  %v2155_v13 = vpop.trf.xlu0  ;;  %1936 = vmatprep.subr.mxu1 %v3276_v42 }
  0x88   :  { %1891 = vmatpush3.msra.mxu0 %v3300_v9  ;;  %1937 = vmatpush3.msra.mxu1 %v3271_v39 }
  0x89   :  { %1892 = vmatprep.subr.mxu0 %v3286_v51  ;;  %1938 = vmatprep.subr.mxu1 %v3253_v47  ;;  %v2212_v6 = vpop.trf.xlu1 }
  0x8a   :  { %1893 = vmatpush3.msra.mxu0 %v3281_v10  ;;  %1939 = vmatpush3.msra.mxu1 %v121_v50  ;;  %v2156_v50 = vunpack.i.l.bf16 %v2155_v13 }
  0x8b   :  { %1894 = vmatprep.subr.mxu0 %v3263_v63  ;;  %v2160_v26 = vpop.trf.xlu0  ;;  %1940 = vmatprep.subr.mxu1 %v136_v53  ;;  %v2208_v53 = vunpack.i.l.bf16 %v2207_v14 }
  0x8c   :  { %1895 = vmatpush3.msra.mxu0 %v3258_v41  ;;  %1941 = vmatpush3.msra.mxu1 %v120_v55  ;;  %v2159_v55 = vunpack.i.h.bf16 %v2155_v13  ;;  %v3976_v13 = vld [vmem:[#allocation20_spill] sm:$0xff] }
  0x8d   :  { %1896 = vmatprep.subr.mxu0 %v104_v11  ;;  %1942 = vmatprep.subr.mxu1 %v3219_v62  ;;  %v2217_v28 = vpop.trf.xlu1  ;;  %v2161_v62 = vunpack.i.l.bf16 %v2160_v26 }
  0x8e   :  { %1897 = vmatpush3.msra.mxu0 %v88_v54  ;;  %1943 = vmatpush3.msra.mxu1 %v3214_v7  ;;  %v2211_v54 = vunpack.i.h.bf16 %v2207_v14  ;;  %v2213_v7 = vunpack.i.l.bf16 %v2212_v6 }
  0x8f   :  { %1898 = vmatprep.subr.mxu0 %v3229_v36  ;;  %v2165_v1 = vpop.trf.xlu0  ;;  %1944 = vmatprep.subr.mxu1 %v3195_v23  ;;  %v2164_v23 = vunpack.i.h.bf16 %v2160_v26  ;;  %v3978_v26 = vld [vmem:[#allocation22_spill] sm:$0xff] }
  0x90   :  { %1899 = vmatpush3.msra.mxu0 %v3224_v56  ;;  %1945 = vmatpush3.msra.mxu1 %v3190_v34  ;;  %v3968_v34 = vld [vmem:[#allocation9_spill] sm:$0xff] }
  0x91   :  { %1900 = vmatprep.subr.mxu0 %v3205_v2  ;;  %1946 = vmatprep.subr.mxu1 %v3171_v48  ;;  %v3971_v48 = vld [vmem:[#allocation60_spill] sm:$0xff] }
  0x92   :  { %1901 = vmatpush3.msra.mxu0 %v3200_v4  ;;  %1947 = vmatpush3.msra.mxu1 %v3166_v60  ;;  %v3972_v60 = vld [vmem:[#allocation58_spill] sm:$0xff] }
  0x93   :  { %1902 = vmatprep.subr.mxu0 %v3181_v29  ;;  %1948 = vmatprep.subr.mxu1 %v3147_v44  ;;  %v3969_v44 = vld [vmem:[#allocation10_spill] sm:$0xff] }
  0x94   :  { %1903 = vmatpush3.msra.mxu0 %v3176_v17  ;;  %1949 = vmatpush3.msra.mxu1 %v3142_v22  ;;  %v2216_v22 = vunpack.i.h.bf16 %v2212_v6  ;;  %v3977_v6 = vld [vmem:[#allocation24_spill] sm:$0xff] }
  0x95   :  { %1904 = vmatprep.subr.mxu0 %v3157_v61  ;;  %465 = vmatprep.mubr.f32.mxu0 %v2156_v50  ;;  %v3981_v50 = vld [vmem:[#allocation30_spill] sm:$0xff] }
  0x96   :  { %1905 = vmatpush3.msra.mxu0 %v3152_v57  ;;  %550 = vmatprep.mubr.f32.mxu1 %v2208_v53  ;;  %v3982_v53 = vld [vmem:[#allocation33_spill] sm:$0xff] }
  0x97   :  { %1906 = vmatprep.subr.mxu0 %v3133_v49  ;;  %1950 = vmatprep.subr.mxu1 %v3123_v3  ;;  %v2221_v3 = vunpack.i.h.bf16 %v2217_v28 }
  0x98   :  { %551 = vmatmul.mubr.f32.gmra.mxu1 %v2211_v54  ;;  %466 = vmatmul.mubr.f32.gmra.mxu0 %v2159_v55  ;;  %v3983_v54 = vld [vmem:[#allocation32_spill] sm:$0xff]  ;;  %v3984_v55 = vld [vmem:[#allocation34_spill] sm:$0xff] }
  0x99   :  { %1951 = vmatpush3.msra.mxu1 %v3118_v58  ;;  %1907 = vmatpush3.msra.mxu0 %v3128_v45  ;;  %v2166_v58 = vunpack.i.l.bf16 %v2165_v1 }
  0x9a   :  { %1952 = vmatprep.subr.mxu1 %v3099_v52  ;;  %1908 = vmatprep.subr.mxu0 %v3109_v38  ;;  %v2218_v52 = vunpack.i.l.bf16 %v2217_v28  ;;  %v3979_v28 = vld [vmem:[#allocation27_spill] sm:$0xff] }
  0x9b   :  { %1953 = vmatpush3.msra.mxu1 %v3094_v46  ;;  %1909 = vmatpush3.msra.mxu0 %v3104_v35  ;;  %v2169_v46 = vunpack.i.h.bf16 %v2165_v1  ;;  %v3980_v1 = vld [vmem:[#allocation29_spill] sm:$0xff] }
  0x9c   :  { %470 = vmatprep.mubr.f32.mxu0 %v2161_v62  ;;  %555 = vmatprep.mubr.f32.mxu1 %v2213_v7  ;;  %v3985_v62 = vld [vmem:[#allocation37_spill] sm:$0xff]  ;;  %v3986_v7 = vld [vmem:[#allocation40_spill] sm:$0xff] }
  0x9d   :  { %1910 = vmatprep.subr.mxu0 %v3085_v32  ;;  %1954 = vmatprep.subr.mxu1 %v3075_v40  ;;  %v3967_v40 = vld [vmem:[#allocation8_spill] sm:$0xff] }
  0x9e   :  { %556 = vmatmul.mubr.f32.gmra.mxu1 %v2216_v22  ;;  %471 = vmatmul.mubr.f32.gmra.mxu0 %v2164_v23  ;;  %v3987_v22 = vld [vmem:[#allocation39_spill] sm:$0xff]  ;;  %v3988_v23 = vld [vmem:[#allocation42_spill] sm:$0xff] }
  0x9f   :  { %1955 = vmatpush3.msra.mxu1 %v3070_v37  ;;  %1911 = vmatpush3.msra.mxu0 %v3080_v30  ;;  %v3966_v37 = vld [vmem:[#allocation61_spill] sm:$0xff] }
  0xa0   :  { %1956 = vmatprep.subr.mxu1 %v3051_v33  ;;  %1912 = vmatprep.subr.mxu0 %v3061_v24  ;;  %v3964_v33 = vld [vmem:[#allocation62_spill] sm:$0xff] }
  0xa1   :  { %1957 = vmatpush3.msra.mxu1 %v3046_v31  ;;  %1913 = vmatpush3.msra.mxu0 %v3056_v8  ;;  %v3965_v31 = vld [vmem:[#allocation63_spill] sm:$0xff] }
  0xa2   :  { %475 = vmatprep.mubr.f32.mxu0 %v2166_v58  ;;  %560 = vmatprep.mubr.f32.mxu1 %v2218_v52  ;;  %v3989_v58 = vld [vmem:[#allocation43_spill] sm:$0xff]  ;;  %v3990_v52 = vld [vmem:[#allocation44_spill] sm:$0xff] }
  0xa3   :  { %1914 = vmatprep.subr.mxu0 %v3037_v19  ;;  %1958 = vmatprep.subr.mxu1 %v3027_v27  ;;  %v3970_v27 = vld [vmem:[#allocation11_spill] sm:$0xff] }
  0xa4   :  { %476 = vmatmul.mubr.f32.gmra.mxu0 %v2169_v46  ;;  %561 = vmatmul.mubr.f32.gmra.mxu1 %v2221_v3  ;;  %v3991_v46 = vld [vmem:[#allocation47_spill] sm:$0xff]  ;;  %v3992_v3 = vld [vmem:[#allocation49_spill] sm:$0xff] }
  0xa5   :  { %1915 = vmatpush3.msra.mxu0 %v3032_v25  ;;  %1959 = vmatpush3.msra.mxu1 %v3022_v5 }
  0xa6   :  { %1916 = vmatprep.subr.mxu0 %v3013_v20  ;;  %1960 = vmatprep.subr.mxu1 %v3964_v33  ;;  %v3993_v33 = vld [vmem:[#allocation50_spill] sm:$0xff] }
  0xa7   :  { %1917 = vmatpush3.msra.mxu0 %v3965_v31  ;;  %1961 = vmatpush3.msra.mxu1 %v3966_v37  ;;  %v3994_v31 = vld [vmem:[#allocation53_spill] sm:$0xff]  ;;  %v3995_v37 = vld [vmem:[#allocation52_spill] sm:$0xff] }
  0xa8   :  { %1918 = vmatprep.subr.mxu0 %v3967_v40  ;;  %1962 = vmatprep.subr.mxu1 %v3968_v34  ;;  %v3996_v40 = vld [vmem:[#allocation54_spill] sm:$0xff]  ;;  %v3997_v34 = vld [vmem:[#allocation55_spill] sm:$0xff] }
  0xa9   :  { %1919 = vmatpush3.msra.mxu0 %v3969_v44  ;;  %1963 = vmatpush3.msra.mxu1 %v3970_v27  ;;  %v3998_v44 = vld [vmem:[#allocation56_spill] sm:$0xff]  ;;  %v3999_v27 = vld [vmem:[#allocation51_spill] sm:$0xff] }
  0xaa   :  { %1920 = vmatprep.subr.mxu0 %v3971_v48  ;;  %1964 = vmatprep.subr.mxu1 %v3972_v60  ;;  %v4000_v48 = vld [vmem:[#allocation46_spill] sm:$0xff]  ;;  %v4001_v60 = vld [vmem:[#allocation48_spill] sm:$0xff] }
  0xab   :  { %1921 = vmatpush3.msra.mxu0 %v3973_v16  ;;  %1965 = vmatpush3.msra.mxu1 %v3974_v18  ;;  %v4002_v16 = vld [vmem:[#allocation45_spill] sm:$0xff] }
  0xac   :  { %1978 = vmatprep.subr.msk.mxu0 %vm759_vm0, %v3975_v43  ;;  %2012 = vmatprep.subr.msk.mxu1 %vm759_vm0, %v3976_v13  ;;  %v4003_v18 = vld [vmem:[#allocation41_spill] sm:$0xff] }
  0xad   :  { %v2360_v43 = vld [vmem:[%s3837_s0 + $0x190] sm:$0xff] }
  0xae   :  { %v2361_v13 = vld [vmem:[%s3837_s0 + $0x10] sm:$0xff] }
  0xc1   :  { %v2306_v14 = vpop.trf.xlu1 }
  0xc2   :  { %v2310_v15 = vunpack.i.h.bf16 %v2306_v14  ;;  %v2307_v5 = vunpack.i.l.bf16 %v2306_v14  ;;  %v4004_v14 = vld [vmem:[#allocation36_spill] sm:$0xff] }
  0xc3   :  { %v2254_v20 = vpop.trf.xlu0 }
  0xc4   :  { %v2258_v25 = vunpack.i.h.bf16 %v2254_v20  ;;  %v2255_v19 = vunpack.i.l.bf16 %v2254_v20  ;;  %715 = vmatprep.mubr.f32.mxu1 %v2307_v5  ;;  %v4006_v20 = vld [vmem:[#allocation35_spill] sm:$0xff] }
  0xc5   :  { %v2311_v8 = vpop.trf.xlu1  ;;  %716 = vmatmul.mubr.f32.vlgmr.msra.gmra.mxu1 %v2310_v15  ;;  %v4005_v15 = vld [vmem:[#allocation38_spill] sm:$0xff]  ;;  %v4007_v5 = vld [vmem:[#allocation31_spill] sm:$0xff] }
  0xc6   :  { %630 = vmatprep.mubr.f32.mxu0 %v2255_v19  ;;  %v2312_v30 = vunpack.i.l.bf16 %v2311_v8  ;;  %v2315_v32 = vunpack.i.h.bf16 %v2311_v8  ;;  %2013 = vmatpush3.xpose.msk.msra.mxu1 %vm759_vm0, %v3978_v26  ;;  %v4009_v19 = vld [vmem:[#allocation28_spill] sm:$0xff]  ;;  %v4010_v8 = vld [vmem:[#allocation25_spill] sm:$0xff] }
  0xc7   :  { %v2259_v24 = vpop.trf.xlu0  ;;  %631 = vmatmul.mubr.f32.vlgmr.msra.gmra.mxu0 %v2258_v25  ;;  %2014 = vmatprep.subr.msk.mxu1 %vm759_vm0, %v3980_v1  ;;  %v4008_v25 = vld [vmem:[#allocation26_spill] sm:$0xff]  ;;  %v2363_v26 = vld [vmem:[%s3837_s0 + $0x88] sm:$0xff] }
  0xc8   :  { %v2260_v35 = vunpack.i.l.bf16 %v2259_v24  ;;  %v2263_v38 = vunpack.i.h.bf16 %v2259_v24  ;;  %720 = vmatprep.mubr.f32.mxu1 %v2312_v30  ;;  %1979 = vmatpush3.xpose.msk.msra.mxu0 %vm759_vm0, %v3977_v6  ;;  %v4011_v24 = vld [vmem:[#allocation21_spill] sm:$0xff]  ;;  %v4012_v30 = vld [vmem:[#allocation18_spill] sm:$0xff]  ;;  %v2365_v1 = vld [vmem:[%s3837_s0 + $0x8] sm:$0xff] }
  0xc9   :  { %v2316_v45 = vpop.trf.xlu1  ;;  %721 = vmatmul.mubr.f32.gmra.mxu1 %v2315_v32  ;;  %1980 = vmatprep.subr.msk.mxu0 %vm759_vm0, %v3979_v28  ;;  %v4013_v32 = vld [vmem:[#allocation19_spill] sm:$0xff]  ;;  %v2362_v6 = vld [vmem:[%s3837_s0 + $0x110] sm:$0xff] }
  0xca   :  { %635 = vmatprep.mubr.f32.mxu0 %v2260_v35  ;;  %v2317_v57 = vunpack.i.l.bf16 %v2316_v45  ;;  %v2320_v61 = vunpack.i.h.bf16 %v2316_v45  ;;  %2015 = vmatpush3.xpose.msk.msra.mxu1 %vm759_vm0, %v3982_v53  ;;  %v4014_v35 = vld [vmem:[#allocation17_spill] sm:$0xff]  ;;  %v4016_v45 = vld [vmem:[#allocation14_spill] sm:$0xff]  ;;  %v2364_v28 = vld [vmem:[%s3837_s0 + $0x188] sm:$0xff] }
  0xcb   :  { %v2264_v49 = vpop.trf.xlu0  ;;  %636 = vmatmul.mubr.f32.gmra.mxu0 %v2263_v38  ;;  %2016 = vmatprep.subr.msk.mxu1 %vm759_vm0, %v3984_v55  ;;  %v4015_v38 = vld [vmem:[#allocation16_spill] sm:$0xff]  ;;  %v2367_v53 = vld [vmem:[%s3837_s0 + $0x80] sm:$0xff] }
  0xcc   :  { %v2265_v17 = vunpack.i.l.bf16 %v2264_v49  ;;  %v2268_v29 = vunpack.i.h.bf16 %v2264_v49  ;;  %725 = vmatprep.mubr.f32.mxu1 %v2317_v57  ;;  %1981 = vmatpush3.xpose.msk.msra.mxu0 %vm759_vm0, %v3981_v50  ;;  %v4017_v49 = vld [vmem:[#allocation15_spill] sm:$0xff]  ;;  %v4018_v57 = vld [vmem:[#allocation13_spill] sm:$0xff] }
  0xcd   :  { %v2321_v4 = vpop.trf.xlu1  ;;  %726 = vmatmul.mubr.f32.gmra.mxu1 %v2320_v61  ;;  %1982 = vmatprep.subr.msk.mxu0 %vm759_vm0, %v3983_v54  ;;  %v4019_v61 = vld [vmem:[#allocation12_spill] sm:$0xff]  ;;  %v2368_v54 = vld [vmem:[%s3837_s0 + $0x180] sm:$0xff] }
  0xce   :  { %640 = vmatprep.mubr.f32.mxu0 %v2265_v17  ;;  %v2322_v56 = vunpack.i.l.bf16 %v2321_v4  ;;  %v2325_v36 = vunpack.i.h.bf16 %v2321_v4  ;;  %2017 = vmatpush3.xpose.msk.msra.mxu1 %vm759_vm0, %v3986_v7  ;;  %v2352_v17 = vld [vmem:[%s3837_s0 + $0x1a0] sm:$0xff]  ;;  %v2366_v50 = vld [vmem:[%s3837_s0 + $0x108] sm:$0xff] }
  0xcf   :  { %v2269_v2 = vpop.trf.xlu0  ;;  %641 = vmatmul.mubr.f32.gmra.mxu0 %v2268_v29  ;;  %2018 = vmatprep.subr.msk.mxu1 %vm759_vm0, %v3988_v23  ;;  %v2353_v29 = vld [vmem:[%s3837_s0 + $0x20] sm:$0xff] }
  0xd0   :  { %v2270_v11 = vunpack.i.l.bf16 %v2269_v2  ;;  %v2273_v59 = vunpack.i.h.bf16 %v2269_v2  ;;  %730 = vmatprep.mubr.f32.mxu1 %v2322_v56  ;;  %1983 = vmatpush3.xpose.msk.msra.mxu0 %vm759_vm0, %v3985_v62  ;;  %v2354_v4 = vld [vmem:[%s3837_s0 + $0x120] sm:$0xff]  ;;  %v2355_v2 = vld [vmem:[%s3837_s0 + $0x98] sm:$0xff] }
  0xd1   :  { %731 = vmatmul.mubr.f32.gmra.mxu1 %v2325_v36  ;;  %1984 = vmatprep.subr.msk.mxu0 %vm759_vm0, %v3987_v22  ;;  %v2356_v56 = vld [vmem:[%s3837_s0 + $0x198] sm:$0xff]  ;;  %v2369_v55 = vld [vmem:[%s3837_s0] sm:$0xff] }
  0xd2   :  { %645 = vmatprep.mubr.f32.mxu0 %v2270_v11  ;;  %2019 = vmatpush3.xpose.msk.msra.mxu1 %vm759_vm0, %v3990_v52  ;;  %v2357_v36 = vld [vmem:[%s3837_s0 + $0x18] sm:$0xff]  ;;  %v2370_v62 = vld [vmem:[%s3837_s0 + $0x100] sm:$0xff] }
  0xd3   :  { %646 = vmatmul.mubr.f32.gmra.mxu0 %v2273_v59  ;;  %2020 = vmatprep.subr.msk.mxu1 %vm759_vm0, %v3992_v3  ;;  %v2358_v11 = vld [vmem:[%s3837_s0 + $0x118] sm:$0xff]  ;;  %v2359_v59 = vld [vmem:[%s3837_s0 + $0x90] sm:$0xff] }
  0xd4   :  { %1985 = vmatpush3.xpose.msk.msra.mxu0 %vm759_vm0, %v3989_v58 }
  0xd5   :  { %1986 = vmatprep.subr.msk.mxu0 %vm759_vm0, %v3991_v46 }
  0xd6   :  { %2021 = vmatpush3.xpose.msk.msra.mxu1 %vm759_vm0, %v3994_v31 }
  0xd7   :  { %2022 = vmatprep.subr.msk.mxu1 %vm759_vm0, %v3996_v40 }
  0xd8   :  { %1987 = vmatpush3.xpose.msk.msra.mxu0 %vm759_vm0, %v3993_v33 }
  0xd9   :  { %1988 = vmatprep.subr.msk.mxu0 %vm759_vm0, %v3995_v37 }
  0xda   :  { %2023 = vmatpush3.xpose.msk.msra.mxu1 %vm759_vm0, %v3998_v44 }
  0xdb   :  { %2024 = vmatprep.subr.msk.mxu1 %vm759_vm0, %v4000_v48  ;;  %v736_v48 = vlaneseq }
  0xdc   :  { %1989 = vmatpush3.xpose.msk.msra.mxu0 %vm759_vm0, %v3997_v34 }
  0xdd   :  { %1990 = vmatprep.subr.msk.mxu0 %vm759_vm0, %v3999_v27 }
  0xde   :  { %2025 = vmatpush3.xpose.msk.msra.mxu1 %vm759_vm0, %v4002_v16  ;;  %v3533_v16 = vshrl.u32 %v736_v48, 7 }
  0xdf   :  { %2026 = vmatprep.subr.msk.mxu1 %vm759_vm0, %v4004_v14 }
  0xe0   :  { %1991 = vmatpush3.xpose.msk.msra.mxu0 %vm759_vm0, %v4001_v60 }
  0xe1   :  { %1992 = vmatprep.subr.msk.mxu0 %vm759_vm0, %v4003_v18 }
  0xe2   :  { %2027 = vmatpush3.xpose.msk.msra.mxu1 %vm759_vm0, %v4006_v20 }
  0xe3   :  { %2028 = vmatprep.subr.msk.mxu1 %vm759_vm0, %v4008_v25 }
  0xe4   :  { %1993 = vmatpush3.xpose.msk.msra.mxu0 %vm759_vm0, %v4005_v15 }
  0xe5   :  { %1994 = vmatprep.subr.msk.mxu0 %vm759_vm0, %v4007_v5 }
  0xe6   :  { %2029 = vmatpush3.xpose.msk.msra.mxu1 %vm759_vm0, %v4010_v8 }
  0xe7   :  { %2030 = vmatprep.subr.msk.mxu1 %vm759_vm0, %v4012_v30 }
  0xe8   :  { %1995 = vmatpush3.xpose.msk.msra.mxu0 %vm759_vm0, %v4009_v19  ;;  %v738_v19 = vadd.s32 8, %v3533_v16 }
  0xe9   :  { %1996 = vmatprep.subr.msk.mxu0 %vm759_vm0, %v4011_v24 }
  0xea   :  { %2031 = vmatpush3.xpose.msk.msra.mxu1 %vm759_vm0, %v4014_v35 }
  0xeb   :  { %2032 = vmatprep.subr.msk.mxu1 %vm759_vm0, %v4016_v45 }
  0xec   :  { %1997 = vmatpush3.xpose.msk.msra.mxu0 %vm759_vm0, %v4013_v32 }
  0xed   :  { %1998 = vmatprep.subr.msk.mxu0 %vm759_vm0, %v4015_v38 }
  0xee   :  { %2033 = vmatpush3.xpose.msk.msra.mxu1 %vm759_vm0, %v4018_v57 }
  0xef   :  { %2034 = vmatprep.subr.msk.mxu1 %vm759_vm0, %v2352_v17 }
  0xf0   :  { %1999 = vmatpush3.xpose.msk.msra.mxu0 %vm759_vm0, %v4017_v49 }
  0xf1   :  { %2000 = vmatprep.subr.msk.mxu0 %vm759_vm0, %v4019_v61  ;;  %v2468_v61 = vmov 0.0  }
  0xf2   :  { %2035 = vmatpush3.xpose.msk.msra.mxu1 %vm759_vm0, %v2354_v4 }
  0xf3   :  { %2036 = vmatprep.subr.msk.mxu1 %vm759_vm0, %v2356_v56  ;;  %v739_v56 = vadd.s32 16, %v3533_v16 }
  0xf4   :  { %2001 = vmatpush3.xpose.msk.msra.mxu0 %vm759_vm0, %v2353_v29 }
  0xf5   :  { %2002 = vmatprep.subr.msk.mxu0 %vm759_vm0, %v2355_v2 }
  0xf6   :  { %2037 = vmatpush3.xpose.msk.msra.mxu1 %vm759_vm0, %v2358_v11 }
  0xf7   :  { %2038 = vmatprep.subr.msk.mxu1 %vm759_vm0, %v2360_v43 }
  0xf8   :  { %2003 = vmatpush3.xpose.msk.msra.mxu0 %vm759_vm0, %v2357_v36 }
  0xf9   :  { %2004 = vmatprep.subr.msk.mxu0 %vm759_vm0, %v2359_v59 }
  0xfa   :  { %2039 = vmatpush3.xpose.msk.msra.mxu1 %vm759_vm0, %v2362_v6 }
  0xfb   :  { %2040 = vmatprep.subr.msk.mxu1 %vm759_vm0, %v2364_v28 }
  0xfc   :  { %2005 = vmatpush3.xpose.msk.msra.mxu0 %vm759_vm0, %v2361_v13 }
  0xfd   :  { %2006 = vmatprep.subr.msk.mxu0 %vm759_vm0, %v2363_v26 }
  0xfe   :  { %2041 = vmatpush3.xpose.msk.msra.mxu1 %vm759_vm0, %v2366_v50 }
  0xff   :  { %2042 = vmatprep.subr.msk.mxu1 %vm759_vm0, %v2368_v54 }
 0x100   :  { %2007 = vmatpush3.xpose.msk.msra.mxu0 %vm759_vm0, %v2365_v1 }
 0x101   :  { %2008 = vmatprep.subr.msk.mxu0 %vm759_vm0, %v2367_v53 }
 0x102   :  { %2043 = vmatpush3.xpose.msk.msra.mxu1 %vm759_vm0, %v2370_v62  ;;  %v740_v62 = vadd.s32 24, %v3533_v16 }
 0x103   :  { %2080 = vmatprep.subr.msk.mxu1 %vm759_vm0, %v2977_v0  ;;  %v3535_v0 = vand.u32 127, %v736_v48 }
 0x104   :  { %2009 = vmatpush3.xpose.msk.msra.mxu0 %vm759_vm0, %v2369_v55 }
 0x105   :  { %2046 = vmatprep.subr.msk.mxu0 %vm759_vm0, %v2959_v21  ;;  %vm743_vm1 = vcmp.eq.s32.totalorder %v3533_v16, %v3535_v0  ;;  %vm744_vm2 = vcmp.eq.s32.totalorder %v738_v19, %v3535_v0  ;;  %vm745_vm3 = vcmp.eq.s32.totalorder %v739_v56, %v3535_v0  ;;  %vm746_vm4 = vcmp.eq.s32.totalorder %v740_v62, %v3535_v0 }
 0x106   :  { %v3541_v17 = vsel %vm743_vm1, 1.0, %v2468_v61  ;;  %v3550_v50 = vsel %vm744_vm2, 1.0, %v2468_v61 }
 0x145   :  { %v1878_v7 = vpop.f32.mrf.mxu1 }
 0x147   :  { %v1834_v22 = vpop.f32.mrf.mxu0  ;;  %v1879_v23 = vpop.f32.mrf.mxu1 }
 0x148   :  { %v1880_v14 = vadd.f32 %v1879_v23, %v1878_v7 }
 0x149   :  { %v1835_v58 = vpop.f32.mrf.mxu0 }
 0x14a   :  { %v1836_v18 = vadd.f32 %v1835_v58, %v1834_v22 }
 0x14c   :  { %v548_v8 = vadd.f32 %v1880_v14, %v1836_v18 }
 0x158   :  { %v1881_v52 = vpop.f32.mrf.mxu1  ;;  %v1837_v46 = vpop.f32.mrf.mxu0 }
 0x15a   :  { %v1882_v3 = vpop.f32.mrf.mxu1  ;;  %v1838_v33 = vpop.f32.mrf.mxu0 }
 0x15b   :  { %v1839_v24 = vadd.f32 %v1838_v33, %v1837_v46  ;;  %v1883_v30 = vadd.f32 %v1882_v3, %v1881_v52 }
 0x15d   :  { %v553_v36 = vadd.f32 %v1883_v30, %v1839_v24 }
 0x15e   :  { %v1884_v31 = vpop.f32.mrf.mxu1  ;;  %v1840_v37 = vpop.f32.mrf.mxu0 }
 0x160   :  { %v1885_v40 = vpop.f32.mrf.mxu1  ;;  %v1841_v34 = vpop.f32.mrf.mxu0 }
 0x161   :  { %v1842_v29 = vadd.f32 %v1841_v34, %v1840_v37  ;;  %v1886_v4 = vadd.f32 %v1885_v40, %v1884_v31  ;;  %v1666_v34 = vsel %vm745_vm3, 1.0, %v2468_v61 }
 0x163   :  { %v558_v53 = vadd.f32 %v1886_v4, %v1842_v29 }
 0x164   :  { %v1887_v44 = vpop.f32.mrf.mxu1  ;;  %v1843_v27 = vpop.f32.mrf.mxu0 }
 0x166   :  { %v1888_v60 = vpop.f32.mrf.mxu1  ;;  %v1844_v21 = vpop.f32.mrf.mxu0 }
 0x167   :  { %v1845_v54 = vadd.f32 %v1844_v21, %v1843_v27  ;;  %v1889_v7 = vadd.f32 %v1888_v60, %v1887_v44 }
 0x169   :  { %v563_v27 = vadd.f32 %v1889_v7, %v1845_v54 }
 0x185   :  { %v1966_v15 = vpop.f32.mrf.mxu1 }
 0x187   :  { %v1922_v20 = vpop.f32.mrf.mxu0  ;;  %v1967_v5 = vpop.f32.mrf.mxu1 }
 0x188   :  { %v1968_v49 = vadd.f32 %v1967_v5, %v1966_v15 }
 0x189   :  { %v1923_v25 = vpop.f32.mrf.mxu0  ;;  %v1969_v35 = vpop.f32.mrf.mxu1 }
 0x18a   :  { %v1924_v32 = vadd.f32 %v1923_v25, %v1922_v20  ;;  %v1667_v20 = vsel %vm746_vm4, 1.0, %v2468_v61 }
 0x18b   :  { %v1925_v38 = vpop.f32.mrf.mxu0  ;;  %v1970_v57 = vpop.f32.mrf.mxu1 }
 0x18c   :  { %v633_v45 = vadd.f32 %v1924_v32, %v548_v8  ;;  %v1971_v26 = vadd.f32 %v1970_v57, %v1969_v35 }
 0x18d   :  { %v1926_v2 = vpop.f32.mrf.mxu0  ;;  %v1972_v43 = vpop.f32.mrf.mxu1 }
 0x18e   :  { %v3545_v11 = vadd.f32 %v1968_v49, %v633_v45  ;;  %v1927_v59 = vadd.f32 %v1926_v2, %v1925_v38 }
 0x18f   :  { %v1928_v13 = vpop.f32.mrf.mxu0  ;;  %v1973_v28 = vpop.f32.mrf.mxu1 }
 0x190   :  { %v638_v6 = vadd.f32 %v1927_v59, %v553_v36  ;;  %v755_v1 = vmul.f32 %v3541_v17, %v3545_v11  ;;  %v1974_v33 = vadd.f32 %v1973_v28, %v1972_v43 }
 0x191   :  { %v1929_v55 = vpop.f32.mrf.mxu0  ;;  %v1975_v58 = vpop.f32.mrf.mxu1 }
 0x192   :  { %v723_v22 = vadd.f32 %v1971_v26, %v638_v6  ;;  %v1930_v23 = vadd.f32 %v1929_v55, %v1928_v13  ;;  %v760_v52 = vsel %vm759_vm0, %v755_v1, 0.0 }
 0x193   :  { %v1931_v46 = vpop.f32.mrf.mxu0  ;;  %761 = vadd.xlane.f32.xlu0 %v760_v52  ;;  %v1976_v40 = vpop.f32.mrf.mxu1 }
 0x194   :  { %v643_v3 = vadd.f32 %v1930_v23, %v558_v53  ;;  %v756_v31 = vmul.f32 %v3550_v50, %v723_v22  ;;  %v1977_v14 = vadd.f32 %v1976_v40, %v1975_v58 }
 0x195   :  { %v1932_v37 = vpop.f32.mrf.mxu0 }
 0x196   :  { %v728_v48 = vadd.f32 %v1974_v33, %v643_v3  ;;  %v1933_v44 = vadd.f32 %v1932_v37, %v1931_v46  ;;  %v763_v60 = vsel %vm759_vm0, %v756_v31, 0.0 }
 0x197   :  { %764 = vadd.xlane.f32.xlu1 %v763_v60  ;;  %v772_v21 = vadd.f32 %v763_v60, %v760_v52 }
 0x198   :  { %v648_v18 = vadd.f32 %v1933_v44, %v563_v27  ;;  %v757_v15 = vmul.f32 %v1666_v34, %v728_v48 }
 0x19a   :  { %v733_v5 = vadd.f32 %v1977_v14, %v648_v18  ;;  %v766_v25 = vsel %vm759_vm0, %v757_v15, 0.0 }
 0x19b   :  { %767 = vadd.xlane.f32.xlu1 %v766_v25  ;;  %v773_v19 = vadd.f32 %v772_v21, %v766_v25 }
 0x19c   :  { %v758_v8 = vmul.f32 %v1667_v20, %v733_v5 }
 0x19e   :  { %v769_v0 = vsel %vm759_vm0, %v758_v8, 0.0 }
 0x19f   :  { %770 = vadd.xlane.f32.xlu1 %v769_v0  ;;  %v774_v24 = vadd.f32 %v773_v19, %v769_v0 }
 0x1a1   :  { %v775_v30 = vrot.slane %v774_v24, 4 }
 0x1a3   :  { %v776_v32 = vadd.f32 %v775_v30, %v774_v24 }
 0x1a5   :  { %v777_v35 = vrot.slane %v776_v32, 2 }
 0x1a7   :  { %v778_v38 = vadd.f32 %v777_v35, %v776_v32 }
 0x1a9   :  { %v779_v45 = vrot.slane %v778_v38, 1 }
 0x1ab   :  { %v780_v49 = vadd.f32 %v779_v45, %v778_v38 }
 0x1ad   :  { %v789_v29 = vmax.f32 %v780_v49, 1e-30 }
 0x21c   :  { %v762_v57 = vpop.xlane.xlu0 %761 }
 0x21d   :  { %v781_v4 = vmax.f32 %v762_v57, 1e-30 }
 0x21f   :  { %2326 = vrsqrt.f32 %v781_v4 }
 0x220   :  { %v765_v2 = vpop.xlane.xlu1 %764  ;;  %2328 = vrsqrt.f32 %v789_v29 }
 0x221   :  { %v782_v56 = vmax.f32 %v765_v2, 1e-30 }
 0x223   :  { %2330 = vrsqrt.f32 %v782_v56 }
 0x224   :  { %v768_v36 = vpop.xlane.xlu1 %767 }
 0x225   :  { %v783_v59 = vmax.f32 %v768_v36, 1e-30 }
 0x227   :  { %2332 = vrsqrt.f32 %v783_v59 }
 0x228   :  { %v771_v43 = vpop.xlane.xlu1 %770 }
 0x229   :  { %v784_v13 = vmax.f32 %v771_v43, 1e-30 }
 0x22b   :  { %2334 = vrsqrt.f32 %v784_v13 }
 0x22c   :  { %v2327_v6 = vpop.eup %2326 }
 0x22d   :  { %v791_v26 = vmul.f32 %v2327_v6, %v3545_v11  ;;  %v2329_v28 = vpop.eup %2328 }
 0x22f   :  { %v795_v1 = vmul.f32 %v2329_v28, %v791_v26 }
 0x230   :  { %v2331_v53 = vpop.eup %2330 }
 0x231   :  { %v799_v54 = vsub.f32 %v795_v1, %v3541_v17  ;;  %v792_v55 = vmul.f32 %v2331_v53, %v723_v22 }
 0x233   :  { %v803_v62 = vsel %vm759_vm0, %v799_v54, 0.0  ;;  %v796_v7 = vmul.f32 %v2329_v28, %v792_v55 }
 0x234   :  { %v2333_v23 = vpop.eup %2332  ;;  %818 = vadd.xlane.f32.xlu0 %v803_v62 }
 0x235   :  { %v800_v58 = vsub.f32 %v796_v7, %v3550_v50  ;;  %v793_v52 = vmul.f32 %v2333_v23, %v728_v48 }
 0x237   :  { %v804_v46 = vsel %vm759_vm0, %v800_v58, 0.0  ;;  %v797_v3 = vmul.f32 %v2329_v28, %v793_v52 }
 0x238   :  { %v2335_v33 = vpop.eup %2334  ;;  %820 = vadd.xlane.f32.xlu1 %v804_v46  ;;  %v805_v17 = vadd.f32 %v804_v46, %v803_v62 }
 0x239   :  { %v801_v11 = vsub.f32 %v797_v3, %v1666_v34  ;;  %v794_v31 = vmul.f32 %v2335_v33, %v733_v5 }
 0x23b   :  { %v806_v37 = vsel %vm759_vm0, %v801_v11, 0.0  ;;  %v798_v40 = vmul.f32 %v2329_v28, %v794_v31 }
 0x23c   :  { %822 = vadd.xlane.f32.xlu0 %v806_v37  ;;  %v807_v27 = vadd.f32 %v806_v37, %v805_v17 }
 0x23d   :  { %v802_v22 = vsub.f32 %v798_v40, %v1667_v20 }
 0x23f   :  { %v808_v44 = vsel %vm759_vm0, %v802_v22, 0.0 }
 0x240   :  { %824 = vadd.xlane.f32.xlu1 %v808_v44  ;;  %v809_v60 = vadd.f32 %v808_v44, %v807_v27 }
 0x242   :  { %v810_v50 = vrot.slane %v809_v60, 4 }
 0x244   :  { %v811_v48 = vadd.f32 %v810_v50, %v809_v60 }
 0x246   :  { %v812_v21 = vrot.slane %v811_v48, 2 }
 0x248   :  { %v813_v18 = vadd.f32 %v812_v21, %v811_v48 }
 0x24a   :  { %v814_v14 = vrot.slane %v813_v18, 1 }
 0x24c   :  { %v815_v15 = vadd.f32 %v814_v14, %v813_v18 }
 0x24e   :  { %v817_v25 = vmul.f32 0.03125, %v815_v15 }
 0x250   :  { %vm830_vm5 = vcmp.le.f32.partialorder %v817_v25, 0.05 }
 0x251   :  { %v3570_v34 = vsel %vm830_vm5, 1.0, %v2468_v61 }
 0x252   :  { %v833_v5 = vsel %vm759_vm0, %v3570_v34, 0.0 }
 0x253   :  { %834 = vadd.xlane.f32.xlu1 %v833_v5 }
 0x2bd   :  { %v819_v20 = vpop.xlane.xlu0 %818 }
 0x2be   :  { %v826_v19 = vmul.f32 0.03125, %v819_v20 }
 0x2c0   :  { %2336 = vrcp.f32 %v826_v19  ;;  %vm840_vm7 = vcmp.lt.f32.partialorder %v817_v25, %v826_v19 }
 0x2c1   :  { %v821_v8 = vpop.xlane.xlu1 %820 }
 0x2c2   :  { %v827_v0 = vmul.f32 0.03125, %v821_v8 }
 0x2c4   :  { %2338 = vrcp.f32 %v827_v0  ;;  %vm841_vm6 = vcmp.lt.f32.partialorder %v817_v25, %v827_v0 }
 0x2c5   :  { %v823_v24 = vpop.xlane.xlu0 %822 }
 0x2c6   :  { %v828_v30 = vmul.f32 0.03125, %v823_v24 }
 0x2c8   :  { %2340 = vrcp.f32 %v828_v30  ;;  %vm842_vm8 = vcmp.lt.f32.partialorder %v817_v25, %v828_v30 }
 0x2c9   :  { %v825_v32 = vpop.xlane.xlu1 %824 }
 0x2ca   :  { %v829_v35 = vmul.f32 0.03125, %v825_v32 }
 0x2cc   :  { %2342 = vrcp.f32 %v829_v35  ;;  %vm843_vm9 = vcmp.lt.f32.partialorder %v817_v25, %v829_v35 }
 0x2cd   :  { %v2337_v38 = vpop.eup %2336 }
 0x2ce   :  { %v845_v57 = vmul.f32 %v2337_v38, %v817_v25 }
 0x2d0   :  { %v852_v56 = vsel %vm840_vm7, %v845_v57, 1.0  ;;  %v2382_v57 = vld [vmem:[%s3837_s0 + $0x250] sm:$0xff] }
 0x2d1   :  { %v2339_v45 = vpop.eup %2338  ;;  %v856_v6 = vmul.f32 %v852_v56, %v799_v54  ;;  %v2386_v56 = vld [vmem:[%s3837_s0 + $0x248] sm:$0xff] }
 0x2d2   :  { %v847_v49 = vmul.f32 %v2339_v45, %v817_v25 }
 0x2d3   :  { %v860_v55 = vsel %vm759_vm0, %v856_v6, -inf  ;;  %v2391_v6 = vld [vmem:[%s3837_s0 + $0x340] sm:$0xff] }
 0x2d4   :  { %v853_v4 = vsel %vm841_vm6, %v847_v49, 1.0 }
 0x2d5   :  { %v2341_v29 = vpop.eup %2340  ;;  %v857_v43 = vmul.f32 %v853_v4, %v800_v58  ;;  %v2384_v4 = vld [vmem:[%s3837_s0 + $0x2c8] sm:$0xff] }
 0x2d6   :  { %v849_v2 = vmul.f32 %v2341_v29, %v817_v25  ;;  %v2383_v29 = vld [vmem:[%s3837_s0 + $0x350] sm:$0xff] }
 0x2d7   :  { %v861_v1 = vsel %vm759_vm0, %v857_v43, -inf  ;;  %v2389_v43 = vld [vmem:[%s3837_s0 + $0x3c0] sm:$0xff] }
 0x2d8   :  { %v854_v36 = vsel %vm842_vm8, %v849_v2, 1.0  ;;  %v864_v23 = vmax.f32 %v860_v55, %v861_v1  ;;  %v2385_v2 = vld [vmem:[%s3837_s0 + $0x3c8] sm:$0xff]  ;;  %v2394_v1 = vld [vmem:[%s3837_s0 + $0x238] sm:$0xff]  ;;  %v2396_v55 = vld [vmem:[%s3837_s0 + $0x2b0] sm:$0xff] }
 0x2d9   :  { %v2343_v59 = vpop.eup %2342  ;;  %v858_v26 = vmul.f32 %v854_v36, %v801_v11  ;;  %v2387_v36 = vld [vmem:[%s3837_s0 + $0x348] sm:$0xff] }
 0x2da   :  { %v851_v13 = vmul.f32 %v2343_v59, %v817_v25  ;;  %v2388_v59 = vld [vmem:[%s3837_s0 + $0x2c0] sm:$0xff] }
 0x2db   :  { %v862_v62 = vsel %vm759_vm0, %v858_v26, -inf  ;;  %v2392_v26 = vld [vmem:[%s3837_s0 + $0x2b8] sm:$0xff] }
 0x2dc   :  { %v855_v28 = vsel %vm843_vm9, %v851_v13, 1.0  ;;  %v835_v20 = vpop.xlane.xlu1 %834  ;;  %v2390_v13 = vld [vmem:[%s3837_s0 + $0x240] sm:$0xff] }
 0x2dd   :  { %v859_v53 = vmul.f32 %v855_v28, %v802_v22  ;;  %vm836_vm12 = vcmp.lt.f32.partialorder %v835_v20, 10.0  ;;  %v2393_v28 = vld [vmem:[%s3837_s0 + $0x3b8] sm:$0xff]  ;;  %v2423_v20 = vld [vmem:[%s3837_s0 + $0x300] sm:$0xff] }
 0x2de   :  { %v839_v24 = vsel %vm836_vm12, 1.0, %v3570_v34  ;;  %v2381_v34 = vld [vmem:[%s3837_s0 + $0x3d0] sm:$0xff] }
 0x2df   :  { %v863_v7 = vsel %vm759_vm0, %v859_v53, -inf  ;;  %v2395_v53 = vld [vmem:[%s3837_s0 + $0x338] sm:$0xff] }
 0x2e0   :  { %v865_v52 = vmax.f32 %v862_v62, %v863_v7  ;;  %v2397_v62 = vld [vmem:[%s3837_s0 + $0x3b0] sm:$0xff] }
 0x2e1   :  { %v2398_v7 = vld [vmem:[%s3837_s0 + $0x230] sm:$0xff] }
 0x2e2   :  { %v866_v46 = vmax.f32 %v864_v23, %v865_v52  ;;  %v2399_v23 = vld [vmem:[%s3837_s0 + $0x330] sm:$0xff]  ;;  %v2400_v52 = vld [vmem:[%s3837_s0 + $0x2a8] sm:$0xff] }
 0x2e4   :  { %v867_v3 = vrot.slane %v866_v46, 4 }
 0x2e6   :  { %v868_v33 = vmax.f32 %v866_v46, %v867_v3  ;;  %v2401_v46 = vld [vmem:[%s3837_s0 + $0x3a8] sm:$0xff] }
 0x2e7   :  { %v2402_v3 = vld [vmem:[%s3837_s0 + $0x228] sm:$0xff] }
 0x2e8   :  { %v869_v58 = vrot.slane %v868_v33, 2 }
 0x2ea   :  { %v870_v31 = vmax.f32 %v868_v33, %v869_v58  ;;  %v2403_v33 = vld [vmem:[%s3837_s0 + $0x328] sm:$0xff]  ;;  %v2404_v58 = vld [vmem:[%s3837_s0 + $0x2a0] sm:$0xff] }
 0x2ec   :  { %v871_v54 = vrot.slane %v870_v31, 1 }
 0x2ee   :  { %v872_v11 = vmax.f32 %v870_v31, %v871_v54  ;;  %v2405_v31 = vld [vmem:[%s3837_s0 + $0x3a0] sm:$0xff] }
 0x2ef   :  { %v2406_v54 = vld [vmem:[%s3837_s0 + $0x220] sm:$0xff] }
 0x2f0   :  { %v873_v37 = vsub.f32 1.0, %v872_v11  ;;  %v2407_v11 = vld [vmem:[%s3837_s0 + $0x320] sm:$0xff] }
 0x2f2   :  { %v874_v40 = vmax.f32 %v873_v37, 0.0  ;;  %v2408_v37 = vld [vmem:[%s3837_s0 + $0x298] sm:$0xff] }
 0x2f4   :  { %v875_v17 = vmin.f32 %v874_v40, 1.0  ;;  %v2409_v40 = vld [vmem:[%s3837_s0 + $0x398] sm:$0xff] }
 0x2f6   :  { %v876_v22 = vsel %vm759_vm0, %v875_v17, -inf }
 0x2f7   :  { %877 = vmax.xlane.f32.xlu0 %v876_v22  ;;  %v2411_v22 = vld [vmem:[%s3837_s0 + $0x318] sm:$0xff] }
 0x380   :  { %v878_v27 = vpop.xlane.xlu0 %877 }
 0x381   :  { %2344 = vrcp.f32 %v878_v27  ;;  %v2412_v27 = vld [vmem:[%s3837_s0 + $0x290] sm:$0xff] }
 0x38e   :  { %v2345_v44 = vpop.eup %2344 }
 0x38f   :  { %v880_v60 = vmul.f32 %v2345_v44, %v875_v17  ;;  %v2410_v17 = vld [vmem:[%s3837_s0 + $0x218] sm:$0xff]  ;;  %v2413_v44 = vld [vmem:[%s3837_s0 + $0x390] sm:$0xff] }
 0x391   :  { %vm881_vm10 = vcmp.eq.f32.partialorder %v880_v60, 1.0 }
 0x392   :  { %v882_v50 = vsel %vm881_vm10, 0.99, %v880_v60  ;;  %v2414_v60 = vld [vmem:[%s3837_s0 + $0x210] sm:$0xff] }
 0x393   :  { %v883_v48 = vsub.f32 1.0, %v882_v50 }
 0x395   :  { %2346 = vrcp.f32 %v883_v48  ;;  %v2416_v48 = vld [vmem:[%s3837_s0 + $0x288] sm:$0xff] }
 0x3a2   :  { %v2347_v21 = vpop.eup %2346 }
 0x3a3   :  { %v885_v18 = vmul.f32 %v2347_v21, %v882_v50  ;;  %v2415_v50 = vld [vmem:[%s3837_s0 + $0x310] sm:$0xff]  ;;  %v2417_v21 = vld [vmem:[%s3837_s0 + $0x388] sm:$0xff] }
 0x3a5   :  { %2348 = vlog2.f32 %v885_v18  ;;  %v2418_v18 = vld [vmem:[%s3837_s0 + $0x208] sm:$0xff] }
 0x3b2   :  { %v2349_v14 = vpop.eup %2348 }
 0x3b3   :  { %v887_v15 = vmul.f32 0.6931472, %v2349_v14  ;;  %v2419_v14 = vld [vmem:[%s3837_s0 + $0x308] sm:$0xff] }
 0x3b5   :  { %v888_v25 = vadd.f32 0.5, %v887_v15  ;;  %v2420_v15 = vld [vmem:[%s3837_s0 + $0x280] sm:$0xff] }
 0x3b7   :  { %v889_v5 = vand.u32 2147483647, %v888_v25 }
 0x3b9   :  { %vm890_vm11 = vcmp.eq.f32.partialorder %v889_v5, inf  ;;  %v2422_v5 = vld [vmem:[%s3837_s0 + $0x200] sm:$0xff] }
 0x3ba   :  { %v1669_v19 = vsel %vm890_vm11, 1.0, %v2468_v61  ;;  %v2380_v61 = vld [vmem:[%s3837_s0 + $0x2d0] sm:$0xff] }
 0x3bb   :  { %v893_v8 = vadd.f32 %v1669_v19, %v888_v25 }
 0x3bd   :  { %vm894_vm13 = vcmp.gt.f32.partialorder %v893_v8, 1.0 }
 0x3be   :  { %v895_v0 = vsel %vm894_vm13, 1.0, %v888_v25  ;;  %v2421_v25 = vld [vmem:[%s3837_s0 + $0x380] sm:$0xff] }
 0x3bf   :  { %vm896_vm14 = vcmp.lt.f32.partialorder %v895_v0, 0.0 }
 0x3c0   :  { %v897_v30 = vsel %vm896_vm14, 0.0, %v895_v0 }
 0x3c1   :  { %v898_v32 = vmul.f32 %v897_v30, %v839_v24 }
 0x3c3   :  { %v899_v35 = vsel %vm759_vm0, %v898_v32, 0.0  ;;  %905 = vst.msk [vmem:[#allocation4] sm:$0x1] %vm904_vm15, %v898_v32 }
 0x3c4   :  { %900 = vadd.xlane.f32.xlu0 %v899_v35 }
 0x44d   :  { %v901_v38 = vpop.xlane.xlu0 %900 }
 0x44e   :  { %2350 = vrcp.f32 %v901_v38 }
 0x45b   :  { %v2351_v45 = vpop.eup %2350 }
 0x45c   :  { %v3582_v49 = vmul.f32 %v2351_v45, %v898_v32 }
 0x45e   :  { %2010 = vmatprep.mubr.msk.f32.mxu0 %vm759_vm0, %v3582_v49  ;;  %2044 = vmatprep.mubr.msk.f32.mxu1 %vm759_vm0, %v3582_v49 }
 0x45f   :  { %2011 = vmatmul.mubr.msk.f32.vlgmr.msra.gmra.mxu0 %vm759_vm0, %v3582_v49  ;;  %2045 = vmatmul.mubr.msk.f32.vlgmr.msra.gmra.mxu1 %vm759_vm0, %v3582_v49 }
 0x460   :  { %2047 = vmatpush3.xpose.msk.msra.mxu0 %vm759_vm0, %v3300_v9  ;;  %2081 = vmatpush3.xpose.msk.msra.mxu1 %vm759_vm0, %v3295_v12  ;;  %v2371_v12 = vld [vmem:[%s3837_s0 + $0x368] sm:$0xff]  ;;  %v2376_v9 = vld [vmem:[%s3837_s0 + $0x2d8] sm:$0xff] }
 0x461   :  { %2078 = vmatprep.mubr.msk.f32.mxu0 %vm759_vm0, %v3582_v49  ;;  %2112 = vmatprep.mubr.msk.f32.mxu1 %vm759_vm0, %v3582_v49 }
 0x462   :  { %2048 = vmatprep.subr.msk.mxu0 %vm759_vm0, %v3286_v51  ;;  %2082 = vmatprep.subr.msk.mxu1 %vm759_vm0, %v3276_v42  ;;  %v2372_v42 = vld [vmem:[%s3837_s0 + $0x2e0] sm:$0xff]  ;;  %v2379_v51 = vld [vmem:[%s3837_s0 + $0x358] sm:$0xff] }
 0x464   :  { %2049 = vmatpush3.xpose.msk.msra.mxu0 %vm759_vm0, %v3281_v10  ;;  %2083 = vmatpush3.xpose.msk.msra.mxu1 %vm759_vm0, %v3271_v39  ;;  %v2373_v39 = vld [vmem:[%s3837_s0 + $0x3e0] sm:$0xff]  ;;  %v2378_v10 = vld [vmem:[%s3837_s0 + $0x258] sm:$0xff] }
 0x465   :  { %2050 = vmatprep.subr.msk.mxu0 %vm759_vm0, %v3263_v63  ;;  %2084 = vmatprep.subr.msk.mxu1 %vm759_vm0, %v3253_v47  ;;  %v2375_v47 = vld [vmem:[%s3837_s0 + $0x360] sm:$0xff]  ;;  %v2377_v63 = vld [vmem:[%s3837_s0 + $0x3d8] sm:$0xff] }
 0x468   :  { %2051 = vmatpush3.xpose.msk.msra.mxu0 %vm759_vm0, %v3258_v41  ;;  %2085 = vmatpush3.xpose.msk.msra.mxu1 %vm759_vm0, %v2371_v12  ;;  %v2374_v41 = vld [vmem:[%s3837_s0 + $0x260] sm:$0xff] }
 0x469   :  { %2052 = vmatprep.subr.msk.mxu0 %vm759_vm0, %v2372_v42  ;;  %2086 = vmatprep.subr.msk.mxu1 %vm759_vm0, %v2373_v39 }
 0x46c   :  { %2053 = vmatpush3.xpose.msk.msra.mxu0 %vm759_vm0, %v2374_v41  ;;  %2087 = vmatpush3.xpose.msk.msra.mxu1 %vm759_vm0, %v2375_v47 }
 0x46d   :  { %2054 = vmatprep.subr.msk.mxu0 %vm759_vm0, %v2376_v9  ;;  %2088 = vmatprep.subr.msk.mxu1 %vm759_vm0, %v2377_v63 }
 0x470   :  { %2055 = vmatpush3.xpose.msk.msra.mxu0 %vm759_vm0, %v2378_v10  ;;  %2089 = vmatpush3.xpose.msk.msra.mxu1 %vm759_vm0, %v2379_v51 }
 0x471   :  { %2056 = vmatprep.subr.msk.mxu0 %vm759_vm0, %v2380_v61  ;;  %2090 = vmatprep.subr.msk.mxu1 %vm759_vm0, %v2381_v34 }
 0x474   :  { %2057 = vmatpush3.xpose.msk.msra.mxu0 %vm759_vm0, %v2382_v57  ;;  %2091 = vmatpush3.xpose.msk.msra.mxu1 %vm759_vm0, %v2383_v29 }
 0x475   :  { %2058 = vmatprep.subr.msk.mxu0 %vm759_vm0, %v2384_v4  ;;  %2092 = vmatprep.subr.msk.mxu1 %vm759_vm0, %v2385_v2 }
 0x478   :  { %2059 = vmatpush3.xpose.msk.msra.mxu0 %vm759_vm0, %v2386_v56  ;;  %2093 = vmatpush3.xpose.msk.msra.mxu1 %vm759_vm0, %v2387_v36 }
 0x479   :  { %2060 = vmatprep.subr.msk.mxu0 %vm759_vm0, %v2388_v59  ;;  %2094 = vmatprep.subr.msk.mxu1 %vm759_vm0, %v2389_v43 }
 0x47c   :  { %2061 = vmatpush3.xpose.msk.msra.mxu0 %vm759_vm0, %v2390_v13  ;;  %2095 = vmatpush3.xpose.msk.msra.mxu1 %vm759_vm0, %v2391_v6 }
 0x47d   :  { %2062 = vmatprep.subr.msk.mxu0 %vm759_vm0, %v2392_v26  ;;  %2096 = vmatprep.subr.msk.mxu1 %vm759_vm0, %v2393_v28 }
 0x480   :  { %2063 = vmatpush3.xpose.msk.msra.mxu0 %vm759_vm0, %v2394_v1  ;;  %2097 = vmatpush3.xpose.msk.msra.mxu1 %vm759_vm0, %v2395_v53 }
 0x481   :  { %2064 = vmatprep.subr.msk.mxu0 %vm759_vm0, %v2396_v55  ;;  %2098 = vmatprep.subr.msk.mxu1 %vm759_vm0, %v2397_v62 }
 0x484   :  { %2065 = vmatpush3.xpose.msk.msra.mxu0 %vm759_vm0, %v2398_v7  ;;  %2099 = vmatpush3.xpose.msk.msra.mxu1 %vm759_vm0, %v2399_v23 }
 0x485   :  { %2066 = vmatprep.subr.msk.mxu0 %vm759_vm0, %v2400_v52  ;;  %2100 = vmatprep.subr.msk.mxu1 %vm759_vm0, %v2401_v46 }
 0x488   :  { %2067 = vmatpush3.xpose.msk.msra.mxu0 %vm759_vm0, %v2402_v3  ;;  %2101 = vmatpush3.xpose.msk.msra.mxu1 %vm759_vm0, %v2403_v33 }
 0x489   :  { %2068 = vmatprep.subr.msk.mxu0 %vm759_vm0, %v2404_v58  ;;  %2102 = vmatprep.subr.msk.mxu1 %vm759_vm0, %v2405_v31 }
 0x48c   :  { %2069 = vmatpush3.xpose.msk.msra.mxu0 %vm759_vm0, %v2406_v54  ;;  %2103 = vmatpush3.xpose.msk.msra.mxu1 %vm759_vm0, %v2407_v11 }
 0x48d   :  { %2070 = vmatprep.subr.msk.mxu0 %vm759_vm0, %v2408_v37  ;;  %2104 = vmatprep.subr.msk.mxu1 %vm759_vm0, %v2409_v40 }
 0x490   :  { %2071 = vmatpush3.xpose.msk.msra.mxu0 %vm759_vm0, %v2410_v17  ;;  %2105 = vmatpush3.xpose.msk.msra.mxu1 %vm759_vm0, %v2411_v22 }
 0x491   :  { %2072 = vmatprep.subr.msk.mxu0 %vm759_vm0, %v2412_v27  ;;  %2106 = vmatprep.subr.msk.mxu1 %vm759_vm0, %v2413_v44 }
 0x494   :  { %2073 = vmatpush3.xpose.msk.msra.mxu0 %vm759_vm0, %v2414_v60  ;;  %2107 = vmatpush3.xpose.msk.msra.mxu1 %vm759_vm0, %v2415_v50 }
 0x495   :  { %2074 = vmatprep.subr.msk.mxu0 %vm759_vm0, %v2416_v48  ;;  %2108 = vmatprep.subr.msk.mxu1 %vm759_vm0, %v2417_v21 }
 0x498   :  { %2075 = vmatpush3.xpose.msk.msra.mxu0 %vm759_vm0, %v2418_v18  ;;  %2109 = vmatpush3.xpose.msk.msra.mxu1 %vm759_vm0, %v2419_v14 }
 0x499   :  { %2076 = vmatprep.subr.msk.mxu0 %vm759_vm0, %v2420_v15  ;;  %2110 = vmatprep.subr.msk.mxu1 %vm759_vm0, %v2421_v25 }
 0x49c   :  { %2077 = vmatpush3.xpose.msk.msra.mxu0 %vm759_vm0, %v2422_v5  ;;  %2111 = vmatpush3.xpose.msk.msra.mxu1 %vm759_vm0, %v2423_v20 }
 0x49f   :  { %2079 = vmatmul.mubr.msk.f32.vlgmr.msra.gmra.mxu0 %vm759_vm0, %v3582_v49  ;;  %2113 = vmatmul.mubr.msk.f32.vlgmr.msra.gmra.mxu1 %vm759_vm0, %v3582_v49 }
 0x4a0   :  { %2435 = shalt.err (!%p2432_p4)
}
 0x4a1   :  { %1655 = dma.vmem_to_hbm [thread:$0]  %s1653_s18, 16, %s3839_s2, [#allocation5]   ;;  %v2470_v19 = vmov 1966171168  }
 0x4a2   :  { %v1590_v8 = vunpack.c.l.s4 %v2470_v19  ;;  %s2471_s2 = smov [#allocation2]  }
 0x4a3   :  { %s1642_s22 = sshll.u32 %s2471_s2, 4  ;;  %s1643_s22 = int_to_ptr.vmem [resolvable:$true] %s1642_s22 }
 0x4a4   :  { %v1591_v30 = vunpack.c.0.s8 %v1590_v8  ;;  %s2444_s23 = scalar_lea.vmem %s1643_s22, 128  ;;  %p2449_p6 = scmp.lt.s32.totalorder %s1643_s22, %s1643_s22 }
 0x4a5   :  { %p2445_p5 = scmp.ne.s32.totalorder %s1643_s22, %s2444_s23  ;;  %p2450_p7 = scmp.lt.s32.totalorder %s2444_s23, %s2444_s23 }
 0x4a6   :  { %v1594_v45 = vsub.s32 %v1591_v30, %v3533_v16 }
 0x4a7   :  { %p2451_p8 = por %p2450_p7, %p2449_p6 }
 0x4a9   :  { %p2452_p9 = pnand %p2451_p8, %p2445_p5 }
 0x51f   :  { %v1359_v0 = vpop.f32.mrf.mxu0  ;;  %v1430_v24 = vpop.f32.mrf.mxu1 }
 0x521   :  { %v1361_v32 = vpop.f32.mrf.mxu0  ;;  %v1432_v35 = vpop.f32.mrf.mxu1 }
 0x522   :  { %v1585_v38 = vcombine.low %v1359_v0, %v1361_v32  ;;  %v1586_v49 = vcombine.low %v1430_v24, %v1432_v35 }
 0x524   :  { %v1595_v39 = vrot.slane %v1585_v38, %v1594_v45  ;;  %v1602_v41 = vrot.slane %v1586_v49, %v1594_v45 }
 0x526   :  { %v1617_v51 = vcombine.low %v1595_v39, %v1602_v41 }
 0x528   :  { %v1625_v29 = vrot.slane %v1617_v51, %v1594_v45 }
 0x55f   :  { %v1501_v12 = vpop.f32.mrf.mxu0  ;;  %v1572_v42 = vpop.f32.mrf.mxu1 }
 0x561   :  { %v1503_v47 = vpop.f32.mrf.mxu0  ;;  %v1574_v9 = vpop.f32.mrf.mxu1 }
 0x562   :  { %v1587_v63 = vcombine.low %v1501_v12, %v1503_v47  ;;  %v1588_v10 = vcombine.low %v1572_v42, %v1574_v9 }
 0x564   :  { %v1609_v61 = vrot.slane %v1587_v63, %v1594_v45  ;;  %v1616_v34 = vrot.slane %v1588_v10, %v1594_v45 }
 0x566   :  { %v1618_v57 = vcombine.low %v1609_v61, %v1616_v34 }
 0x568   :  { %v1632_v4 = vrot.slane %v1618_v57, %v1594_v45 }
 0x56a   :  { %v1633_v2 = vcombine.low %v1625_v29, %v1632_v4 }
 0x56c   :  { %1635 = vst [vmem:[#allocation2] sm:$0xff] %v1633_v2 }
 0x56d   :  { %2455 = shalt.err (!%p2452_p9)
}
 0x56e   :  { %1645 = dma.vmem_to_hbm [thread:$0]  %s1643_s22, 128, %s3838_s1, [#allocation3]  }
 0x56f   :  { %2464 = dma.done.wait [#allocation3], 128  }
 0x570   :  { %2465 = vsyncadd [#allocation3], 4294967168 }
 0x571   :  { %2466 = dma.done.wait [#allocation5], 16  }
 0x572   :  { %2467 = vsyncadd [#allocation5], 4294967280 }
 0x573   :  { %1662 = vsyncpa [#allocation3], 1 }
 0x574   :  { %1663 = vsyncpa [#allocation5], 1 }

</bundles_post_ra>
